<compile_context>
chip_gen: v5e
topology: v5e:2x2
jax: 0.10.0
libtpu: 0.0.40
codegen_flags: <defaults>
</compile_context>

<pallas_src>
import math
import jax
import jax.numpy as jnp
from jax.experimental import pallas as pl
from jax.experimental.pallas import tpu as pltpu


# ----------------------------- in-kernel helpers -----------------------------

def _layer_norm(x, w, b, eps=1e-5):
    # x: (N, D), w/b: (1, D) -- matches nn.LayerNorm(embedding_dim), eps=1e-5
    mu = jnp.mean(x, axis=-1, keepdims=True)
    xc = x - mu
    var = jnp.mean(xc * xc, axis=-1, keepdims=True)
    return xc * jax.lax.rsqrt(var + eps) * w + b


def _erf(x):
    # Abramowitz & Stegun 7.1.26 rational approximation, |error| <= 1.5e-7.
    # Uses only exp / mul / add / div / where, which always lower on Mosaic.
    p = 0.3275911
    a1, a2, a3, a4, a5 = (0.254829592, -0.284496736, 1.421413741,
                          -1.453152027, 1.061405429)
    z = jnp.abs(x)
    t = 1.0 / (1.0 + p * z)
    poly = ((((a5 * t + a4) * t + a3) * t + a2) * t + a1) * t
    e = 1.0 - poly * jnp.exp(-z * z)
    return jnp.where(x >= 0.0, e, -e)


def _gelu(x):
    # PyTorch nn.GELU() default (exact erf form), to ~1e-7.
    return 0.5 * x * (1.0 + _erf(x * (1.0 / math.sqrt(2.0))))


def _dot_t(a_f32, w_bf16):
    # a: (N, in) f32, w: (out, in) bf16 (PyTorch Linear layout) -> (N, out) f32 (== a @ w.T)
    # bf16 MXU inputs, f32 accumulation.
    return jax.lax.dot_general(a_f32.astype(jnp.bfloat16), w_bf16,
                               (((1,), (1,)), ((), ())),
                               preferred_element_type=jnp.float32)


# ----------------------------- fused EncoderCls kernel -----------------------------

def make_encoder_cls_kernel(num_heads, n_ffnn_linears, embed_dim, seq_len, batch_block):
    D = embed_dim
    S = seq_len                      # S0 + 1 (CLS prepended)
    Bb = batch_block                 # batch elements folded into one grid step
    dh = D // num_heads
    scale = 1.0 / math.sqrt(dh)

    def kernel(x_ref, cls_ref, pe_ref, in_w_ref, in_b_ref, out_w_ref,
               dv_ref, hb_ref, *rest):
        fw_refs = rest[:n_ffnn_linears]
        o_ref = rest[n_ffnn_linears]
        acts_ref = rest[n_ffnn_linears + 1]     # (Bb*S, D) f32, VMEM-resident across layers
        l = pl.program_id(1)

        # ---- layer-0 prologue: prepend CLS vector + add positional encoding ----
        @pl.when(l == 0)
        def _():
            pe = pe_ref[...]                     # (S, D)
            cls = cls_ref[...]                   # (1, D)
            rows = jnp.concatenate(
                [jnp.concatenate([cls, x_ref[0, b]], axis=0) + pe for b in range(Bb)],
                axis=0)                          # (Bb*S, D)
            acts_ref[...] = rows

        x = acts_ref[...]                        # (Bb*S, D) f32

        # ---- per-layer weights: resident in VMEM, indexed by the layer grid axis ----
        in_w = in_w_ref[l]                       # (3D, D) bf16
        in_b = in_b_ref[l]                       # (1, 3D) f32
        out_w = out_w_ref[l]                     # (D, D)  bf16
        dv = dv_ref[l]                           # (6, D)  f32 (packed small vectors)
        out_b = dv[0:1, :]
        ln1_w, ln1_b = dv[1:2, :], dv[2:3, :]
        ln2_w, ln2_b = dv[3:4, :], dv[4:5, :]
        ffnn_b_last = dv[5:6, :]
        hb = hb_ref[l]                           # (n_hidden, H) f32

        # ---- multi-head self-attention (nn.MultiheadAttention, Q=K=V=x) ----
        qkv = _dot_t(x, in_w) + in_b             # one folded (Bb*S, 3D) projection
        q = (qkv[:, 0:D] * scale).astype(jnp.bfloat16)
        k = qkv[:, D:2 * D].astype(jnp.bfloat16)
        v = qkv[:, 2 * D:3 * D].astype(jnp.bfloat16)

        ctx_parts = []
        for b in range(Bb):                      # static unroll (small B)
            r = slice(b * S, (b + 1) * S)
            head_parts = []
            for h in range(num_heads):           # static unroll over heads
                c = slice(h * dh, (h + 1) * dh)
                s = jax.lax.dot_general(q[r, c], k[r, c],
                                        (((1,), (1,)), ((), ())),
                                        preferred_element_type=jnp.float32)
                s = s - jnp.max(s, axis=-1, keepdims=True)
                p = jnp.exp(s)
                p = p / jnp.sum(p, axis=-1, keepdims=True)   # exact softmax denom
                head_parts.append(jnp.dot(p.astype(jnp.bfloat16), v[r, c],
                                          preferred_element_type=jnp.float32))
            # register-level concat of per-head outputs (D <= 128: one vreg row)
            ctx_parts.append(jnp.concatenate(head_parts, axis=-1))   # (S, D)
        ctx = jnp.concatenate(ctx_parts, axis=0)                     # (Bb*S, D)
        # TODO(synk): for D > 128 switch back to a VMEM ctx scratch with lane-slice stores.

        attn = _dot_t(ctx, out_w) + out_b        # out_proj
        # dropout (eval) -> identity; residual + LayerNorm
        h1 = _layer_norm(attn + x, ln1_w, ln1_b)

        # ---- FFNN: [Linear -> GELU (-> Dropout=id)] * num_hidden, final Linear ----
        y = h1
        for i in range(n_ffnn_linears):
            b_i = hb[i:i + 1, :] if i < n_ffnn_linears - 1 else ffnn_b_last
            y = _dot_t(y, fw_refs[i][l]) + b_i
            if i < n_ffnn_linears - 1:
                y = _gelu(y)

        # residual + LayerNorm, stays resident for the next layer
        new_x = _layer_norm(y + h1, ln2_w, ln2_b)
        acts_ref[...] = new_x

        # ---- epilogue: emit CLS rows (lane-dense (Bb, D) slab) after the last block ----
        @pl.when(l == pl.num_programs(1) - 1)
        def _():
            cls_rows = jnp.concatenate(
                [new_x[b * S:b * S + 1, :] for b in range(Bb)], axis=0)   # (Bb, D)
            o_ref[0] = cls_rows

    return kernel


# ----------------------------- parameter packing & forward -----------------------------

def pack_block_params(blocks):
    # Stack per-block parameters along a leading layer axis; big matrices in bf16,
    # small vectors consolidated into a few f32 arrays (fewer DMA descriptors).
    in_w = jnp.stack([b['in_w'] for b in blocks]).astype(jnp.bfloat16)     # (L, 3D, D)
    in_b = jnp.stack([b['in_b'] for b in blocks])                          # (L, 1, 3D)
    out_w = jnp.stack([b['out_w'] for b in blocks]).astype(jnp.bfloat16)   # (L, D, D)
    dvecs = jnp.stack([jnp.concatenate(
        [b['out_b'], b['ln1_w'], b['ln1_b'], b['ln2_w'], b['ln2_b'], b['ffnn_b'][-1]],
        axis=0) for b in blocks])                                          # (L, 6, D)
    hb = jnp.stack([jnp.concatenate(b['ffnn_b'][:-1], axis=0)
                    for b in blocks])                                      # (L, nh, H)
    n_lin = len(blocks[0]['ffnn_w'])
    fws = [jnp.stack([b['ffnn_w'][i] for b in blocks]).astype(jnp.bfloat16)
           for i in range(n_lin)]
    return in_w, in_b, out_w, dvecs, hb, fws


def encoder_cls_forward(x, params, num_heads, num_batch_blocks=1):
    # x: [B, S0, D]  ->  CLS vector [B, 1, D]
    # num_batch_blocks=1 folds the whole batch into each grid step (best at small B);
    # raise to 2 on v7x (2 TensorCores) if B >= 2 and per-core slab occupancy allows.
    B, S0, D = x.shape
    S = S0 + 1
    assert B % num_batch_blocks == 0
    Bb = B // num_batch_blocks
    G = num_batch_blocks

    blocks = params['blocks']
    L = len(blocks)
    in_w, in_b, out_w, dvecs, hb, fws = pack_block_params(blocks)
    n_lin = len(fws)
    cls = params['cls']                         # (1, D)
    pe_s = params['pe'][:S, :]                  # (S, D)

    kernel = make_encoder_cls_kernel(num_heads, n_lin, D, S, Bb)

    def resident_spec(arr):
        # Whole-array block, constant index_map -> DMA'd into VMEM exactly once,
        # never re-fetched across grid steps.
        nd = arr.ndim
        return pl.BlockSpec(arr.shape, lambda g, l, _nd=nd: (0,) * _nd)

    x4 = x.reshape(G, Bb, S0, D)

    in_specs = [
        pl.BlockSpec((1, Bb, S0, D), lambda g, l: (g, 0, 0, 0)),   # x (read only at l==0)
        resident_spec(cls), resident_spec(pe_s),
        resident_spec(in_w), resident_spec(in_b), resident_spec(out_w),
        resident_spec(dvecs), resident_spec(hb),
    ] + [resident_spec(fw) for fw in fws]

    out3d = pl.pallas_call(
        kernel,
        out_shape=jax.ShapeDtypeStruct((G, Bb, D), jnp.float32),
        grid=(G, L),
        in_specs=in_specs,
        out_specs=pl.BlockSpec((1, Bb, D), lambda g, l: (g, 0, 0)),
        scratch_shapes=[pltpu.VMEM((Bb * S, D), jnp.float32)],     # resident activations
        compiler_params=pltpu.CompilerParams(
            dimension_semantics=("parallel", "arbitrary"),
            # 48 MiB: leaves headroom within v7x's 64 MiB physical VMEM; far more than
            # needed here (all resident weights + activations are well under 1 MiB).
            vmem_limit_bytes=48 * 1024 * 1024),
    )(x4, cls, pe_s, in_w, in_b, out_w, dvecs, hb, *fws)

    return out3d.reshape(B, 1, D)


# ----------------------------- parameter initialisation -----------------------------

def init_params(key, embedding_dim, ffnn_hidden_dim, num_ffnn_hidden_layers,
                num_encoder_blocks, max_seq_len):
    D, H = embedding_dim, ffnn_hidden_dim
    keys = iter(jax.random.split(key, 512))

    def nrm(shape, scale):
        return (scale * jax.random.normal(next(keys), shape)).astype(jnp.float32)

    params = {}
    params['cls'] = nrm((1, D), 1.0)                       # PrependClsVector.cls_vector

    # PositionalEncoding buffer (handles odd D like the PyTorch module)
    D_pe = D if D % 2 == 0 else D + 1
    pos = jnp.arange(max_seq_len, dtype=jnp.float32)[:, None]
    div = jnp.exp(jnp.arange(0, D_pe, 2, dtype=jnp.float32) * (-math.log(10000.0) / D_pe))
    pe = jnp.zeros((max_seq_len, D_pe), jnp.float32)
    pe = pe.at[:, 0::2].set(jnp.sin(pos * div))
    pe = pe.at[:, 1::2].set(jnp.cos(pos * div))
    params['pe'] = pe[:, :D]

    blocks = []
    for _ in range(num_encoder_blocks):
        blk = {
            'in_w': nrm((3 * D, D), 1.0 / math.sqrt(D)),    # nn.MultiheadAttention in_proj
            'in_b': nrm((1, 3 * D), 0.02),
            'out_w': nrm((D, D), 1.0 / math.sqrt(D)),       # out_proj
            'out_b': nrm((1, D), 0.02),
            'ln1_w': jnp.ones((1, D), jnp.float32),
            'ln1_b': jnp.zeros((1, D), jnp.float32),
            'ln2_w': jnp.ones((1, D), jnp.float32),
            'ln2_b': jnp.zeros((1, D), jnp.float32),
        }
        ffnn_w, ffnn_b = [], []
        in_dim = D
        for _ in range(num_ffnn_hidden_layers):
            ffnn_w.append(nrm((H, in_dim), 1.0 / math.sqrt(in_dim)))
            ffnn_b.append(nrm((1, H), 0.02))
            in_dim = H
        ffnn_w.append(nrm((D, in_dim), 1.0 / math.sqrt(in_dim)))   # final Linear(H, D)
        ffnn_b.append(nrm((1, D), 0.02))
        blk['ffnn_w'] = ffnn_w
        blk['ffnn_b'] = ffnn_b
        blocks.append(blk)
    params['blocks'] = blocks
    return params


# ----------------------------- main -----------------------------

if __name__ == "__main__":
    embedding_dim = 32
    num_heads = 4
    ffnn_hidden_dim = 64
    num_ffnn_hidden_layers = 2
    num_encoder_blocks = 3
    max_seq_len = 64
    B, S0 = 2, 8

    key = jax.random.PRNGKey(0)
    kp, kx = jax.random.split(key)
    params = init_params(kp, embedding_dim, ffnn_hidden_dim,
                         num_ffnn_hidden_layers, num_encoder_blocks, max_seq_len)
    x = jax.random.normal(kx, (B, S0, embedding_dim), dtype=jnp.float32)

    out = jax.block_until_ready(encoder_cls_forward(x, params, num_heads))

    assert out.shape == (B, 1, embedding_dim), out.shape
    assert bool(jnp.all(jnp.isfinite(out)))
    print("KERNEL_OK")
</pallas_src>

<mosaic_0001>
module attributes {stable_mosaic.version = 11 : i64} {
  func.func @kernel(%arg0: i32, %arg1: i32, %arg2: memref<1x2x8x32xf32, #tpu.memory_space<vmem>>, %arg3: memref<1x32xf32, #tpu.memory_space<vmem>>, %arg4: memref<9x32xf32, #tpu.memory_space<vmem>>, %arg5: memref<3x96x32xbf16, #tpu.memory_space<vmem>>, %arg6: memref<3x1x96xf32, #tpu.memory_space<vmem>>, %arg7: memref<3x32x32xbf16, #tpu.memory_space<vmem>>, %arg8: memref<3x6x32xf32, #tpu.memory_space<vmem>>, %arg9: memref<3x2x64xf32, #tpu.memory_space<vmem>>, %arg10: memref<3x64x32xbf16, #tpu.memory_space<vmem>>, %arg11: memref<3x64x64xbf16, #tpu.memory_space<vmem>>, %arg12: memref<3x32x64xbf16, #tpu.memory_space<vmem>>, %arg13: memref<1x2x32xf32, #tpu.memory_space<vmem>>, %arg14: memref<18x32xf32, #tpu.memory_space<vmem>>) attributes {dimension_semantics = [#tpu.dimension_semantics<parallel>, #tpu.dimension_semantics<arbitrary>], iteration_bounds = array<i64: 1, 3>, scalar_prefetch = 0 : i64, scratch_operands = 1 : i64, tpu.core_type = #tpu.core_type<tc>, window_params = [{transform_indices = @transform_0, window_bounds = array<i64: 1, 2, 8, 32>}, {pipeline_mode = #tpu.pipeline_mode<synchronous>, transform_indices = @transform_1, window_bounds = array<i64: 1, 32>}, {pipeline_mode = #tpu.pipeline_mode<synchronous>, transform_indices = @transform_2, window_bounds = array<i64: 9, 32>}, {pipeline_mode = #tpu.pipeline_mode<synchronous>, transform_indices = @transform_3, window_bounds = array<i64: 3, 96, 32>}, {pipeline_mode = #tpu.pipeline_mode<synchronous>, transform_indices = @transform_4, window_bounds = array<i64: 3, 1, 96>}, {pipeline_mode = #tpu.pipeline_mode<synchronous>, transform_indices = @transform_5, window_bounds = array<i64: 3, 32, 32>}, {pipeline_mode = #tpu.pipeline_mode<synchronous>, transform_indices = @transform_6, window_bounds = array<i64: 3, 6, 32>}, {pipeline_mode = #tpu.pipeline_mode<synchronous>, transform_indices = @transform_7, window_bounds = array<i64: 3, 2, 64>}, {pipeline_mode = #tpu.pipeline_mode<synchronous>, transform_indices = @transform_8, window_bounds = array<i64: 3, 64, 32>}, {pipeline_mode = #tpu.pipeline_mode<synchronous>, transform_indices = @transform_9, window_bounds = array<i64: 3, 64, 64>}, {pipeline_mode = #tpu.pipeline_mode<synchronous>, transform_indices = @transform_10, window_bounds = array<i64: 3, 32, 64>}, {transform_indices = @transform_11, window_bounds = array<i64: 1, 2, 32>}]} {
    %c0_i32 = arith.constant 0 : i32
    %0 = arith.cmpi eq, %arg1, %c0_i32 : i32
    %1 = arith.extui %0 : i1 to i32
    %c0_i32_0 = arith.constant 0 : i32
    %2 = arith.cmpi ne, %1, %c0_i32_0 : i32
    scf.if %2 {
      %c0_98 = arith.constant 0 : index
      %c0_99 = arith.constant 0 : index
      %313 = vector.load %arg4[%c0_98, %c0_99] : memref<9x32xf32, #tpu.memory_space<vmem>>, vector<9x32xf32>
      %c0_100 = arith.constant 0 : index
      %c0_101 = arith.constant 0 : index
      %314 = vector.load %arg3[%c0_100, %c0_101] : memref<1x32xf32, #tpu.memory_space<vmem>>, vector<1x32xf32>
      %c0_102 = arith.constant 0 : index
      %c0_103 = arith.constant 0 : index
      %c0_104 = arith.constant 0 : index
      %c0_105 = arith.constant 0 : index
      %315 = vector.load %arg2[%c0_102, %c0_103, %c0_104, %c0_105] : memref<1x2x8x32xf32, #tpu.memory_space<vmem>>, vector<1x1x8x32xf32>
      %316 = vector.shape_cast %315 : vector<1x1x8x32xf32> to vector<8x32xf32>
      %317 = tpu.concatenate %314, %316 in 0 : vector<1x32xf32>, vector<8x32xf32> -> vector<9x32xf32>
      %318 = arith.addf %317, %313 : vector<9x32xf32>
      %c0_106 = arith.constant 0 : index
      %c1 = arith.constant 1 : index
      %c0_107 = arith.constant 0 : index
      %c0_108 = arith.constant 0 : index
      %319 = vector.load %arg2[%c0_106, %c1, %c0_107, %c0_108] : memref<1x2x8x32xf32, #tpu.memory_space<vmem>>, vector<1x1x8x32xf32>
      %320 = vector.shape_cast %319 : vector<1x1x8x32xf32> to vector<8x32xf32>
      %321 = tpu.concatenate %314, %320 in 0 : vector<1x32xf32>, vector<8x32xf32> -> vector<9x32xf32>
      %322 = arith.addf %321, %313 : vector<9x32xf32>
      %323 = tpu.concatenate %318, %322 in 0 : vector<9x32xf32>, vector<9x32xf32> -> vector<18x32xf32>
      %c0_109 = arith.constant 0 : index
      %c0_110 = arith.constant 0 : index
      %324 = vector.load %arg14[%c0_109, %c0_110] : memref<18x32xf32, #tpu.memory_space<vmem>>, vector<18x32xf32>
      tpu.vector_store %arg14[%c0_109, %c0_110], %323 {strides = array<i32>} : memref<18x32xf32, #tpu.memory_space<vmem>>, vector<18x32xf32>,
    } else {
    }
    %c0 = arith.constant 0 : index
    %c0_1 = arith.constant 0 : index
    %3 = vector.load %arg14[%c0, %c0_1] : memref<18x32xf32, #tpu.memory_space<vmem>>, vector<18x32xf32>
    %4 = arith.index_cast %arg1 : i32 to index
    %c0_2 = arith.constant 0 : index
    %c0_3 = arith.constant 0 : index
    %5 = vector.load %arg5[%4, %c0_2, %c0_3] : memref<3x96x32xbf16, #tpu.memory_space<vmem>>, vector<1x96x32xbf16>
    %6 = vector.shape_cast %5 : vector<1x96x32xbf16> to vector<96x32xbf16>
    %7 = arith.index_cast %arg1 : i32 to index
    %c0_4 = arith.constant 0 : index
    %c0_5 = arith.constant 0 : index
    %8 = vector.load %arg6[%7, %c0_4, %c0_5] : memref<3x1x96xf32, #tpu.memory_space<vmem>>, vector<1x1x96xf32>
    %9 = vector.shape_cast %8 : vector<1x1x96xf32> to vector<1x96xf32>
    %10 = arith.index_cast %arg1 : i32 to index
    %c0_6 = arith.constant 0 : index
    %c0_7 = arith.constant 0 : index
    %11 = vector.load %arg7[%10, %c0_6, %c0_7] : memref<3x32x32xbf16, #tpu.memory_space<vmem>>, vector<1x32x32xbf16>
    %12 = vector.shape_cast %11 : vector<1x32x32xbf16> to vector<32x32xbf16>
    %13 = arith.index_cast %arg1 : i32 to index
    %c0_8 = arith.constant 0 : index
    %c0_9 = arith.constant 0 : index
    %14 = vector.load %arg8[%13, %c0_8, %c0_9] : memref<3x6x32xf32, #tpu.memory_space<vmem>>, vector<1x6x32xf32>
    %15 = vector.shape_cast %14 : vector<1x6x32xf32> to vector<6x32xf32>
    %16 = vector.extract_strided_slice %15 {offsets = [0, 0], sizes = [1, 32], strides = [1, 1]} : vector<6x32xf32> to vector<1x32xf32>
    %17 = vector.extract_strided_slice %15 {offsets = [1, 0], sizes = [1, 32], strides = [1, 1]} : vector<6x32xf32> to vector<1x32xf32>
    %18 = vector.extract_strided_slice %15 {offsets = [2, 0], sizes = [1, 32], strides = [1, 1]} : vector<6x32xf32> to vector<1x32xf32>
    %19 = vector.extract_strided_slice %15 {offsets = [3, 0], sizes = [1, 32], strides = [1, 1]} : vector<6x32xf32> to vector<1x32xf32>
    %20 = vector.extract_strided_slice %15 {offsets = [4, 0], sizes = [1, 32], strides = [1, 1]} : vector<6x32xf32> to vector<1x32xf32>
    %21 = vector.extract_strided_slice %15 {offsets = [5, 0], sizes = [1, 32], strides = [1, 1]} : vector<6x32xf32> to vector<1x32xf32>
    %22 = arith.index_cast %arg1 : i32 to index
    %c0_10 = arith.constant 0 : index
    %c0_11 = arith.constant 0 : index
    %23 = vector.load %arg9[%22, %c0_10, %c0_11] : memref<3x2x64xf32, #tpu.memory_space<vmem>>, vector<1x2x64xf32>
    %24 = vector.shape_cast %23 : vector<1x2x64xf32> to vector<2x64xf32>
    %25 = arith.truncf %3 : vector<18x32xf32> to vector<18x32xbf16>
    %cst = arith.constant dense<0.000000e+00> : vector<18x96xf32>
    %26 = tpu.matmul %25, %6, %cst {dimension_numbers = #tpu.dot_dimension_numbers<[1], [1], [0], [0], [0, 0, 1, 0], [], []>} : vector<18x32xbf16>, vector<96x32xbf16>, vector<18x96xf32> -> vector<18x96xf32>
    %27 = vector.broadcast %9 : vector<1x96xf32> to vector<18x96xf32>
    %28 = arith.addf %26, %27 : vector<18x96xf32>
    %29 = vector.extract_strided_slice %28 {offsets = [0, 0], sizes = [18, 32], strides = [1, 1]} : vector<18x96xf32> to vector<18x32xf32>
    %cst_12 = arith.constant 0.353553385 : f32
    %30 = vector.broadcast %cst_12 : f32 to vector<18x32xf32>
    %31 = arith.mulf %29, %30 : vector<18x32xf32>
    %32 = arith.truncf %31 : vector<18x32xf32> to vector<18x32xbf16>
    %33 = vector.extract_strided_slice %28 {offsets = [0, 32], sizes = [18, 32], strides = [1, 1]} : vector<18x96xf32> to vector<18x32xf32>
    %34 = arith.truncf %33 : vector<18x32xf32> to vector<18x32xbf16>
    %35 = vector.extract_strided_slice %28 {offsets = [0, 64], sizes = [18, 32], strides = [1, 1]} : vector<18x96xf32> to vector<18x32xf32>
    %36 = arith.truncf %35 : vector<18x32xf32> to vector<18x32xbf16>
    %37 = vector.extract_strided_slice %32 {offsets = [0, 0], sizes = [9, 8], strides = [1, 1]} : vector<18x32xbf16> to vector<9x8xbf16>
    %38 = vector.extract_strided_slice %34 {offsets = [0, 0], sizes = [9, 8], strides = [1, 1]} : vector<18x32xbf16> to vector<9x8xbf16>
    %cst_13 = arith.constant dense<0.000000e+00> : vector<9x9xf32>
    %39 = tpu.matmul %37, %38, %cst_13 {dimension_numbers = #tpu.dot_dimension_numbers<[1], [1], [0], [0], [0, 0, 1, 0], [], []>} : vector<9x8xbf16>, vector<9x8xbf16>, vector<9x9xf32> -> vector<9x9xf32>
    %cst_14 = arith.constant dense<0xFF800000> : vector<9xf32>
    %40 = vector.multi_reduction <maximumf>, %39, %cst_14 [1] : vector<9x9xf32> to vector<9xf32>
    %41 = vector.shape_cast %40 : vector<9xf32> to vector<9x1xf32>
    %42 = vector.broadcast %41 : vector<9x1xf32> to vector<9x9xf32>
    %43 = arith.subf %39, %42 : vector<9x9xf32>
    %44 = math.exp %43 : vector<9x9xf32>
    %cst_15 = arith.constant dense<0.000000e+00> : vector<9xf32>
    %45 = vector.multi_reduction <add>, %44, %cst_15 [1] : vector<9x9xf32> to vector<9xf32>
    %46 = vector.shape_cast %45 : vector<9xf32> to vector<9x1xf32>
    %47 = vector.broadcast %46 : vector<9x1xf32> to vector<9x9xf32>
    %48 = arith.divf %44, %47 : vector<9x9xf32>
    %49 = arith.truncf %48 : vector<9x9xf32> to vector<9x9xbf16>
    %50 = vector.extract_strided_slice %36 {offsets = [0, 0], sizes = [9, 8], strides = [1, 1]} : vector<18x32xbf16> to vector<9x8xbf16>
    %cst_16 = arith.constant dense<0.000000e+00> : vector<9x8xf32>
    %51 = tpu.matmul %49, %50, %cst_16 {dimension_numbers = #tpu.dot_dimension_numbers<[1], [0], [0], [1], [0, 0, 1, 1], [], []>} : vector<9x9xbf16>, vector<9x8xbf16>, vector<9x8xf32> -> vector<9x8xf32>
    %52 = vector.extract_strided_slice %32 {offsets = [0, 8], sizes = [9, 8], strides = [1, 1]} : vector<18x32xbf16> to vector<9x8xbf16>
    %53 = vector.extract_strided_slice %34 {offsets = [0, 8], sizes = [9, 8], strides = [1, 1]} : vector<18x32xbf16> to vector<9x8xbf16>
    %cst_17 = arith.constant dense<0.000000e+00> : vector<9x9xf32>
    %54 = tpu.matmul %52, %53, %cst_17 {dimension_numbers = #tpu.dot_dimension_numbers<[1], [1], [0], [0], [0, 0, 1, 0], [], []>} : vector<9x8xbf16>, vector<9x8xbf16>, vector<9x9xf32> -> vector<9x9xf32>
    %cst_18 = arith.constant dense<0xFF800000> : vector<9xf32>
    %55 = vector.multi_reduction <maximumf>, %54, %cst_18 [1] : vector<9x9xf32> to vector<9xf32>
    %56 = vector.shape_cast %55 : vector<9xf32> to vector<9x1xf32>
    %57 = vector.broadcast %56 : vector<9x1xf32> to vector<9x9xf32>
    %58 = arith.subf %54, %57 : vector<9x9xf32>
    %59 = math.exp %58 : vector<9x9xf32>
    %cst_19 = arith.constant dense<0.000000e+00> : vector<9xf32>
    %60 = vector.multi_reduction <add>, %59, %cst_19 [1] : vector<9x9xf32> to vector<9xf32>
    %61 = vector.shape_cast %60 : vector<9xf32> to vector<9x1xf32>
    %62 = vector.broadcast %61 : vector<9x1xf32> to vector<9x9xf32>
    %63 = arith.divf %59, %62 : vector<9x9xf32>
    %64 = arith.truncf %63 : vector<9x9xf32> to vector<9x9xbf16>
    %65 = vector.extract_strided_slice %36 {offsets = [0, 8], sizes = [9, 8], strides = [1, 1]} : vector<18x32xbf16> to vector<9x8xbf16>
    %cst_20 = arith.constant dense<0.000000e+00> : vector<9x8xf32>
    %66 = tpu.matmul %64, %65, %cst_20 {dimension_numbers = #tpu.dot_dimension_numbers<[1], [0], [0], [1], [0, 0, 1, 1], [], []>} : vector<9x9xbf16>, vector<9x8xbf16>, vector<9x8xf32> -> vector<9x8xf32>
    %67 = vector.extract_strided_slice %32 {offsets = [0, 16], sizes = [9, 8], strides = [1, 1]} : vector<18x32xbf16> to vector<9x8xbf16>
    %68 = vector.extract_strided_slice %34 {offsets = [0, 16], sizes = [9, 8], strides = [1, 1]} : vector<18x32xbf16> to vector<9x8xbf16>
    %cst_21 = arith.constant dense<0.000000e+00> : vector<9x9xf32>
    %69 = tpu.matmul %67, %68, %cst_21 {dimension_numbers = #tpu.dot_dimension_numbers<[1], [1], [0], [0], [0, 0, 1, 0], [], []>} : vector<9x8xbf16>, vector<9x8xbf16>, vector<9x9xf32> -> vector<9x9xf32>
    %cst_22 = arith.constant dense<0xFF800000> : vector<9xf32>
    %70 = vector.multi_reduction <maximumf>, %69, %cst_22 [1] : vector<9x9xf32> to vector<9xf32>
    %71 = vector.shape_cast %70 : vector<9xf32> to vector<9x1xf32>
    %72 = vector.broadcast %71 : vector<9x1xf32> to vector<9x9xf32>
    %73 = arith.subf %69, %72 : vector<9x9xf32>
    %74 = math.exp %73 : vector<9x9xf32>
    %cst_23 = arith.constant dense<0.000000e+00> : vector<9xf32>
    %75 = vector.multi_reduction <add>, %74, %cst_23 [1] : vector<9x9xf32> to vector<9xf32>
    %76 = vector.shape_cast %75 : vector<9xf32> to vector<9x1xf32>
    %77 = vector.broadcast %76 : vector<9x1xf32> to vector<9x9xf32>
    %78 = arith.divf %74, %77 : vector<9x9xf32>
    %79 = arith.truncf %78 : vector<9x9xf32> to vector<9x9xbf16>
    %80 = vector.extract_strided_slice %36 {offsets = [0, 16], sizes = [9, 8], strides = [1, 1]} : vector<18x32xbf16> to vector<9x8xbf16>
    %cst_24 = arith.constant dense<0.000000e+00> : vector<9x8xf32>
    %81 = tpu.matmul %79, %80, %cst_24 {dimension_numbers = #tpu.dot_dimension_numbers<[1], [0], [0], [1], [0, 0, 1, 1], [], []>} : vector<9x9xbf16>, vector<9x8xbf16>, vector<9x8xf32> -> vector<9x8xf32>
    %82 = vector.extract_strided_slice %32 {offsets = [0, 24], sizes = [9, 8], strides = [1, 1]} : vector<18x32xbf16> to vector<9x8xbf16>
    %83 = vector.extract_strided_slice %34 {offsets = [0, 24], sizes = [9, 8], strides = [1, 1]} : vector<18x32xbf16> to vector<9x8xbf16>
    %cst_25 = arith.constant dense<0.000000e+00> : vector<9x9xf32>
    %84 = tpu.matmul %82, %83, %cst_25 {dimension_numbers = #tpu.dot_dimension_numbers<[1], [1], [0], [0], [0, 0, 1, 0], [], []>} : vector<9x8xbf16>, vector<9x8xbf16>, vector<9x9xf32> -> vector<9x9xf32>
    %cst_26 = arith.constant dense<0xFF800000> : vector<9xf32>
    %85 = vector.multi_reduction <maximumf>, %84, %cst_26 [1] : vector<9x9xf32> to vector<9xf32>
    %86 = vector.shape_cast %85 : vector<9xf32> to vector<9x1xf32>
    %87 = vector.broadcast %86 : vector<9x1xf32> to vector<9x9xf32>
    %88 = arith.subf %84, %87 : vector<9x9xf32>
    %89 = math.exp %88 : vector<9x9xf32>
    %cst_27 = arith.constant dense<0.000000e+00> : vector<9xf32>
    %90 = vector.multi_reduction <add>, %89, %cst_27 [1] : vector<9x9xf32> to vector<9xf32>
    %91 = vector.shape_cast %90 : vector<9xf32> to vector<9x1xf32>
    %92 = vector.broadcast %91 : vector<9x1xf32> to vector<9x9xf32>
    %93 = arith.divf %89, %92 : vector<9x9xf32>
    %94 = arith.truncf %93 : vector<9x9xf32> to vector<9x9xbf16>
    %95 = vector.extract_strided_slice %36 {offsets = [0, 24], sizes = [9, 8], strides = [1, 1]} : vector<18x32xbf16> to vector<9x8xbf16>
    %cst_28 = arith.constant dense<0.000000e+00> : vector<9x8xf32>
    %96 = tpu.matmul %94, %95, %cst_28 {dimension_numbers = #tpu.dot_dimension_numbers<[1], [0], [0], [1], [0, 0, 1, 1], [], []>} : vector<9x9xbf16>, vector<9x8xbf16>, vector<9x8xf32> -> vector<9x8xf32>
    %97 = tpu.concatenate %51, %66, %81, %96 in 1 : vector<9x8xf32>, vector<9x8xf32>, vector<9x8xf32>, vector<9x8xf32> -> vector<9x32xf32>
    %98 = vector.extract_strided_slice %32 {offsets = [9, 0], sizes = [9, 8], strides = [1, 1]} : vector<18x32xbf16> to vector<9x8xbf16>
    %99 = vector.extract_strided_slice %34 {offsets = [9, 0], sizes = [9, 8], strides = [1, 1]} : vector<18x32xbf16> to vector<9x8xbf16>
    %cst_29 = arith.constant dense<0.000000e+00> : vector<9x9xf32>
    %100 = tpu.matmul %98, %99, %cst_29 {dimension_numbers = #tpu.dot_dimension_numbers<[1], [1], [0], [0], [0, 0, 1, 0], [], []>} : vector<9x8xbf16>, vector<9x8xbf16>, vector<9x9xf32> -> vector<9x9xf32>
    %cst_30 = arith.constant dense<0xFF800000> : vector<9xf32>
    %101 = vector.multi_reduction <maximumf>, %100, %cst_30 [1] : vector<9x9xf32> to vector<9xf32>
    %102 = vector.shape_cast %101 : vector<9xf32> to vector<9x1xf32>
    %103 = vector.broadcast %102 : vector<9x1xf32> to vector<9x9xf32>
    %104 = arith.subf %100, %103 : vector<9x9xf32>
    %105 = math.exp %104 : vector<9x9xf32>
    %cst_31 = arith.constant dense<0.000000e+00> : vector<9xf32>
    %106 = vector.multi_reduction <add>, %105, %cst_31 [1] : vector<9x9xf32> to vector<9xf32>
    %107 = vector.shape_cast %106 : vector<9xf32> to vector<9x1xf32>
    %108 = vector.broadcast %107 : vector<9x1xf32> to vector<9x9xf32>
    %109 = arith.divf %105, %108 : vector<9x9xf32>
    %110 = arith.truncf %109 : vector<9x9xf32> to vector<9x9xbf16>
    %111 = vector.extract_strided_slice %36 {offsets = [9, 0], sizes = [9, 8], strides = [1, 1]} : vector<18x32xbf16> to vector<9x8xbf16>
    %cst_32 = arith.constant dense<0.000000e+00> : vector<9x8xf32>
    %112 = tpu.matmul %110, %111, %cst_32 {dimension_numbers = #tpu.dot_dimension_numbers<[1], [0], [0], [1], [0, 0, 1, 1], [], []>} : vector<9x9xbf16>, vector<9x8xbf16>, vector<9x8xf32> -> vector<9x8xf32>
    %113 = vector.extract_strided_slice %32 {offsets = [9, 8], sizes = [9, 8], strides = [1, 1]} : vector<18x32xbf16> to vector<9x8xbf16>
    %114 = vector.extract_strided_slice %34 {offsets = [9, 8], sizes = [9, 8], strides = [1, 1]} : vector<18x32xbf16> to vector<9x8xbf16>
    %cst_33 = arith.constant dense<0.000000e+00> : vector<9x9xf32>
    %115 = tpu.matmul %113, %114, %cst_33 {dimension_numbers = #tpu.dot_dimension_numbers<[1], [1], [0], [0], [0, 0, 1, 0], [], []>} : vector<9x8xbf16>, vector<9x8xbf16>, vector<9x9xf32> -> vector<9x9xf32>
    %cst_34 = arith.constant dense<0xFF800000> : vector<9xf32>
    %116 = vector.multi_reduction <maximumf>, %115, %cst_34 [1] : vector<9x9xf32> to vector<9xf32>
    %117 = vector.shape_cast %116 : vector<9xf32> to vector<9x1xf32>
    %118 = vector.broadcast %117 : vector<9x1xf32> to vector<9x9xf32>
    %119 = arith.subf %115, %118 : vector<9x9xf32>
    %120 = math.exp %119 : vector<9x9xf32>
    %cst_35 = arith.constant dense<0.000000e+00> : vector<9xf32>
    %121 = vector.multi_reduction <add>, %120, %cst_35 [1] : vector<9x9xf32> to vector<9xf32>
    %122 = vector.shape_cast %121 : vector<9xf32> to vector<9x1xf32>
    %123 = vector.broadcast %122 : vector<9x1xf32> to vector<9x9xf32>
    %124 = arith.divf %120, %123 : vector<9x9xf32>
    %125 = arith.truncf %124 : vector<9x9xf32> to vector<9x9xbf16>
    %126 = vector.extract_strided_slice %36 {offsets = [9, 8], sizes = [9, 8], strides = [1, 1]} : vector<18x32xbf16> to vector<9x8xbf16>
    %cst_36 = arith.constant dense<0.000000e+00> : vector<9x8xf32>
    %127 = tpu.matmul %125, %126, %cst_36 {dimension_numbers = #tpu.dot_dimension_numbers<[1], [0], [0], [1], [0, 0, 1, 1], [], []>} : vector<9x9xbf16>, vector<9x8xbf16>, vector<9x8xf32> -> vector<9x8xf32>
    %128 = vector.extract_strided_slice %32 {offsets = [9, 16], sizes = [9, 8], strides = [1, 1]} : vector<18x32xbf16> to vector<9x8xbf16>
    %129 = vector.extract_strided_slice %34 {offsets = [9, 16], sizes = [9, 8], strides = [1, 1]} : vector<18x32xbf16> to vector<9x8xbf16>
    %cst_37 = arith.constant dense<0.000000e+00> : vector<9x9xf32>
    %130 = tpu.matmul %128, %129, %cst_37 {dimension_numbers = #tpu.dot_dimension_numbers<[1], [1], [0], [0], [0, 0, 1, 0], [], []>} : vector<9x8xbf16>, vector<9x8xbf16>, vector<9x9xf32> -> vector<9x9xf32>
    %cst_38 = arith.constant dense<0xFF800000> : vector<9xf32>
    %131 = vector.multi_reduction <maximumf>, %130, %cst_38 [1] : vector<9x9xf32> to vector<9xf32>
    %132 = vector.shape_cast %131 : vector<9xf32> to vector<9x1xf32>
    %133 = vector.broadcast %132 : vector<9x1xf32> to vector<9x9xf32>
    %134 = arith.subf %130, %133 : vector<9x9xf32>
    %135 = math.exp %134 : vector<9x9xf32>
    %cst_39 = arith.constant dense<0.000000e+00> : vector<9xf32>
    %136 = vector.multi_reduction <add>, %135, %cst_39 [1] : vector<9x9xf32> to vector<9xf32>
    %137 = vector.shape_cast %136 : vector<9xf32> to vector<9x1xf32>
    %138 = vector.broadcast %137 : vector<9x1xf32> to vector<9x9xf32>
    %139 = arith.divf %135, %138 : vector<9x9xf32>
    %140 = arith.truncf %139 : vector<9x9xf32> to vector<9x9xbf16>
    %141 = vector.extract_strided_slice %36 {offsets = [9, 16], sizes = [9, 8], strides = [1, 1]} : vector<18x32xbf16> to vector<9x8xbf16>
    %cst_40 = arith.constant dense<0.000000e+00> : vector<9x8xf32>
    %142 = tpu.matmul %140, %141, %cst_40 {dimension_numbers = #tpu.dot_dimension_numbers<[1], [0], [0], [1], [0, 0, 1, 1], [], []>} : vector<9x9xbf16>, vector<9x8xbf16>, vector<9x8xf32> -> vector<9x8xf32>
    %143 = vector.extract_strided_slice %32 {offsets = [9, 24], sizes = [9, 8], strides = [1, 1]} : vector<18x32xbf16> to vector<9x8xbf16>
    %144 = vector.extract_strided_slice %34 {offsets = [9, 24], sizes = [9, 8], strides = [1, 1]} : vector<18x32xbf16> to vector<9x8xbf16>
    %cst_41 = arith.constant dense<0.000000e+00> : vector<9x9xf32>
    %145 = tpu.matmul %143, %144, %cst_41 {dimension_numbers = #tpu.dot_dimension_numbers<[1], [1], [0], [0], [0, 0, 1, 0], [], []>} : vector<9x8xbf16>, vector<9x8xbf16>, vector<9x9xf32> -> vector<9x9xf32>
    %cst_42 = arith.constant dense<0xFF800000> : vector<9xf32>
    %146 = vector.multi_reduction <maximumf>, %145, %cst_42 [1] : vector<9x9xf32> to vector<9xf32>
    %147 = vector.shape_cast %146 : vector<9xf32> to vector<9x1xf32>
    %148 = vector.broadcast %147 : vector<9x1xf32> to vector<9x9xf32>
    %149 = arith.subf %145, %148 : vector<9x9xf32>
    %150 = math.exp %149 : vector<9x9xf32>
    %cst_43 = arith.constant dense<0.000000e+00> : vector<9xf32>
    %151 = vector.multi_reduction <add>, %150, %cst_43 [1] : vector<9x9xf32> to vector<9xf32>
    %152 = vector.shape_cast %151 : vector<9xf32> to vector<9x1xf32>
    %153 = vector.broadcast %152 : vector<9x1xf32> to vector<9x9xf32>
    %154 = arith.divf %150, %153 : vector<9x9xf32>
    %155 = arith.truncf %154 : vector<9x9xf32> to vector<9x9xbf16>
    %156 = vector.extract_strided_slice %36 {offsets = [9, 24], sizes = [9, 8], strides = [1, 1]} : vector<18x32xbf16> to vector<9x8xbf16>
    %cst_44 = arith.constant dense<0.000000e+00> : vector<9x8xf32>
    %157 = tpu.matmul %155, %156, %cst_44 {dimension_numbers = #tpu.dot_dimension_numbers<[1], [0], [0], [1], [0, 0, 1, 1], [], []>} : vector<9x9xbf16>, vector<9x8xbf16>, vector<9x8xf32> -> vector<9x8xf32>
    %158 = tpu.concatenate %112, %127, %142, %157 in 1 : vector<9x8xf32>, vector<9x8xf32>, vector<9x8xf32>, vector<9x8xf32> -> vector<9x32xf32>
    %159 = tpu.concatenate %97, %158 in 0 : vector<9x32xf32>, vector<9x32xf32> -> vector<18x32xf32>
    %160 = arith.truncf %159 : vector<18x32xf32> to vector<18x32xbf16>
    %cst_45 = arith.constant dense<0.000000e+00> : vector<18x32xf32>
    %161 = tpu.matmul %160, %12, %cst_45 {dimension_numbers = #tpu.dot_dimension_numbers<[1], [1], [0], [0], [0, 0, 1, 0], [], []>} : vector<18x32xbf16>, vector<32x32xbf16>, vector<18x32xf32> -> vector<18x32xf32>
    %162 = vector.broadcast %16 : vector<1x32xf32> to vector<18x32xf32>
    %163 = arith.addf %161, %162 : vector<18x32xf32>
    %164 = arith.addf %163, %3 : vector<18x32xf32>
    %cst_46 = arith.constant dense<0.000000e+00> : vector<18xf32>
    %165 = vector.multi_reduction <add>, %164, %cst_46 [1] : vector<18x32xf32> to vector<18xf32>
    %166 = vector.shape_cast %165 : vector<18xf32> to vector<18x1xf32>
    %cst_47 = arith.constant 3.200000e+01 : f32
    %167 = vector.broadcast %cst_47 : f32 to vector<18x1xf32>
    %168 = arith.divf %166, %167 : vector<18x1xf32>
    %169 = vector.broadcast %168 : vector<18x1xf32> to vector<18x32xf32>
    %170 = arith.subf %164, %169 : vector<18x32xf32>
    %171 = arith.mulf %170, %170 : vector<18x32xf32>
    %cst_48 = arith.constant dense<0.000000e+00> : vector<18xf32>
    %172 = vector.multi_reduction <add>, %171, %cst_48 [1] : vector<18x32xf32> to vector<18xf32>
    %173 = vector.shape_cast %172 : vector<18xf32> to vector<18x1xf32>
    %cst_49 = arith.constant 3.200000e+01 : f32
    %174 = vector.broadcast %cst_49 : f32 to vector<18x1xf32>
    %175 = arith.divf %173, %174 : vector<18x1xf32>
    %cst_50 = arith.constant 9.99999974E-6 : f32
    %176 = vector.broadcast %cst_50 : f32 to vector<18x1xf32>
    %177 = arith.addf %175, %176 : vector<18x1xf32>
    %178 = math.rsqrt %177 : vector<18x1xf32>
    %179 = vector.broadcast %178 : vector<18x1xf32> to vector<18x32xf32>
    %180 = arith.mulf %170, %179 : vector<18x32xf32>
    %181 = vector.broadcast %17 : vector<1x32xf32> to vector<18x32xf32>
    %182 = arith.mulf %180, %181 : vector<18x32xf32>
    %183 = vector.broadcast %18 : vector<1x32xf32> to vector<18x32xf32>
    %184 = arith.addf %182, %183 : vector<18x32xf32>
    %185 = vector.extract_strided_slice %24 {offsets = [0, 0], sizes = [1, 64], strides = [1, 1]} : vector<2x64xf32> to vector<1x64xf32>
    %186 = arith.index_cast %arg1 : i32 to index
    %c0_51 = arith.constant 0 : index
    %c0_52 = arith.constant 0 : index
    %187 = vector.load %arg10[%186, %c0_51, %c0_52] : memref<3x64x32xbf16, #tpu.memory_space<vmem>>, vector<1x64x32xbf16>
    %188 = vector.shape_cast %187 : vector<1x64x32xbf16> to vector<64x32xbf16>
    %189 = arith.truncf %184 : vector<18x32xf32> to vector<18x32xbf16>
    %cst_53 = arith.constant dense<0.000000e+00> : vector<18x64xf32>
    %190 = tpu.matmul %189, %188, %cst_53 {dimension_numbers = #tpu.dot_dimension_numbers<[1], [1], [0], [0], [0, 0, 1, 0], [], []>} : vector<18x32xbf16>, vector<64x32xbf16>, vector<18x64xf32> -> vector<18x64xf32>
    %191 = vector.broadcast %185 : vector<1x64xf32> to vector<18x64xf32>
    %192 = arith.addf %190, %191 : vector<18x64xf32>
    %cst_54 = arith.constant 5.000000e-01 : f32
    %193 = vector.broadcast %cst_54 : f32 to vector<18x64xf32>
    %194 = arith.mulf %193, %192 : vector<18x64xf32>
    %cst_55 = arith.constant 0.707106769 : f32
    %195 = vector.broadcast %cst_55 : f32 to vector<18x64xf32>
    %196 = arith.mulf %192, %195 : vector<18x64xf32>
    %197 = math.absf %196 : vector<18x64xf32>
    %cst_56 = arith.constant 0.327591091 : f32
    %198 = vector.broadcast %cst_56 : f32 to vector<18x64xf32>
    %199 = arith.mulf %198, %197 : vector<18x64xf32>
    %cst_57 = arith.constant 1.000000e+00 : f32
    %200 = vector.broadcast %cst_57 : f32 to vector<18x64xf32>
    %201 = arith.addf %200, %199 : vector<18x64xf32>
    %cst_58 = arith.constant 1.000000e+00 : f32
    %202 = vector.broadcast %cst_58 : f32 to vector<18x64xf32>
    %203 = arith.divf %202, %201 : vector<18x64xf32>
    %cst_59 = arith.constant 1.06140542 : f32
    %204 = vector.broadcast %cst_59 : f32 to vector<18x64xf32>
    %205 = arith.mulf %204, %203 : vector<18x64xf32>
    %cst_60 = arith.constant -1.45315206 : f32
    %206 = vector.broadcast %cst_60 : f32 to vector<18x64xf32>
    %207 = arith.addf %205, %206 : vector<18x64xf32>
    %208 = arith.mulf %207, %203 : vector<18x64xf32>
    %cst_61 = arith.constant 1.42141378 : f32
    %209 = vector.broadcast %cst_61 : f32 to vector<18x64xf32>
    %210 = arith.addf %208, %209 : vector<18x64xf32>
    %211 = arith.mulf %210, %203 : vector<18x64xf32>
    %cst_62 = arith.constant -0.284496725 : f32
    %212 = vector.broadcast %cst_62 : f32 to vector<18x64xf32>
    %213 = arith.addf %211, %212 : vector<18x64xf32>
    %214 = arith.mulf %213, %203 : vector<18x64xf32>
    %cst_63 = arith.constant 0.254829586 : f32
    %215 = vector.broadcast %cst_63 : f32 to vector<18x64xf32>
    %216 = arith.addf %214, %215 : vector<18x64xf32>
    %217 = arith.mulf %216, %203 : vector<18x64xf32>
    %cst_64 = arith.constant 0.000000e+00 : f32
    %218 = vector.broadcast %cst_64 : f32 to vector<18x64xf32>
    %219 = arith.subf %218, %197 : vector<18x64xf32>
    %220 = arith.mulf %219, %197 : vector<18x64xf32>
    %221 = math.exp %220 : vector<18x64xf32>
    %222 = arith.mulf %217, %221 : vector<18x64xf32>
    %cst_65 = arith.constant 1.000000e+00 : f32
    %223 = vector.broadcast %cst_65 : f32 to vector<18x64xf32>
    %224 = arith.subf %223, %222 : vector<18x64xf32>
    %cst_66 = arith.constant 0.000000e+00 : f32
    %225 = vector.broadcast %cst_66 : f32 to vector<18x64xf32>
    %226 = arith.cmpf oge, %196, %225 : vector<18x64xf32>
    %cst_67 = arith.constant 0.000000e+00 : f32
    %227 = vector.broadcast %cst_67 : f32 to vector<18x64xf32>
    %228 = arith.subf %227, %224 : vector<18x64xf32>
    %229 = arith.select %226, %224, %228 : vector<18x64xi1>, vector<18x64xf32>
    %cst_68 = arith.constant 1.000000e+00 : f32
    %230 = vector.broadcast %cst_68 : f32 to vector<18x64xf32>
    %231 = arith.addf %230, %229 : vector<18x64xf32>
    %232 = arith.mulf %194, %231 : vector<18x64xf32>
    %233 = vector.extract_strided_slice %24 {offsets = [1, 0], sizes = [1, 64], strides = [1, 1]} : vector<2x64xf32> to vector<1x64xf32>
    %234 = arith.index_cast %arg1 : i32 to index
    %c0_69 = arith.constant 0 : index
    %c0_70 = arith.constant 0 : index
    %235 = vector.load %arg11[%234, %c0_69, %c0_70] : memref<3x64x64xbf16, #tpu.memory_space<vmem>>, vector<1x64x64xbf16>
    %236 = vector.shape_cast %235 : vector<1x64x64xbf16> to vector<64x64xbf16>
    %237 = arith.truncf %232 : vector<18x64xf32> to vector<18x64xbf16>
    %cst_71 = arith.constant dense<0.000000e+00> : vector<18x64xf32>
    %238 = tpu.matmul %237, %236, %cst_71 {dimension_numbers = #tpu.dot_dimension_numbers<[1], [1], [0], [0], [0, 0, 1, 0], [], []>} : vector<18x64xbf16>, vector<64x64xbf16>, vector<18x64xf32> -> vector<18x64xf32>
    %239 = vector.broadcast %233 : vector<1x64xf32> to vector<18x64xf32>
    %240 = arith.addf %238, %239 : vector<18x64xf32>
    %cst_72 = arith.constant 5.000000e-01 : f32
    %241 = vector.broadcast %cst_72 : f32 to vector<18x64xf32>
    %242 = arith.mulf %241, %240 : vector<18x64xf32>
    %cst_73 = arith.constant 0.707106769 : f32
    %243 = vector.broadcast %cst_73 : f32 to vector<18x64xf32>
    %244 = arith.mulf %240, %243 : vector<18x64xf32>
    %245 = math.absf %244 : vector<18x64xf32>
    %cst_74 = arith.constant 0.327591091 : f32
    %246 = vector.broadcast %cst_74 : f32 to vector<18x64xf32>
    %247 = arith.mulf %246, %245 : vector<18x64xf32>
    %cst_75 = arith.constant 1.000000e+00 : f32
    %248 = vector.broadcast %cst_75 : f32 to vector<18x64xf32>
    %249 = arith.addf %248, %247 : vector<18x64xf32>
    %cst_76 = arith.constant 1.000000e+00 : f32
    %250 = vector.broadcast %cst_76 : f32 to vector<18x64xf32>
    %251 = arith.divf %250, %249 : vector<18x64xf32>
    %cst_77 = arith.constant 1.06140542 : f32
    %252 = vector.broadcast %cst_77 : f32 to vector<18x64xf32>
    %253 = arith.mulf %252, %251 : vector<18x64xf32>
    %cst_78 = arith.constant -1.45315206 : f32
    %254 = vector.broadcast %cst_78 : f32 to vector<18x64xf32>
    %255 = arith.addf %253, %254 : vector<18x64xf32>
    %256 = arith.mulf %255, %251 : vector<18x64xf32>
    %cst_79 = arith.constant 1.42141378 : f32
    %257 = vector.broadcast %cst_79 : f32 to vector<18x64xf32>
    %258 = arith.addf %256, %257 : vector<18x64xf32>
    %259 = arith.mulf %258, %251 : vector<18x64xf32>
    %cst_80 = arith.constant -0.284496725 : f32
    %260 = vector.broadcast %cst_80 : f32 to vector<18x64xf32>
    %261 = arith.addf %259, %260 : vector<18x64xf32>
    %262 = arith.mulf %261, %251 : vector<18x64xf32>
    %cst_81 = arith.constant 0.254829586 : f32
    %263 = vector.broadcast %cst_81 : f32 to vector<18x64xf32>
    %264 = arith.addf %262, %263 : vector<18x64xf32>
    %265 = arith.mulf %264, %251 : vector<18x64xf32>
    %cst_82 = arith.constant 0.000000e+00 : f32
    %266 = vector.broadcast %cst_82 : f32 to vector<18x64xf32>
    %267 = arith.subf %266, %245 : vector<18x64xf32>
    %268 = arith.mulf %267, %245 : vector<18x64xf32>
    %269 = math.exp %268 : vector<18x64xf32>
    %270 = arith.mulf %265, %269 : vector<18x64xf32>
    %cst_83 = arith.constant 1.000000e+00 : f32
    %271 = vector.broadcast %cst_83 : f32 to vector<18x64xf32>
    %272 = arith.subf %271, %270 : vector<18x64xf32>
    %cst_84 = arith.constant 0.000000e+00 : f32
    %273 = vector.broadcast %cst_84 : f32 to vector<18x64xf32>
    %274 = arith.cmpf oge, %244, %273 : vector<18x64xf32>
    %cst_85 = arith.constant 0.000000e+00 : f32
    %275 = vector.broadcast %cst_85 : f32 to vector<18x64xf32>
    %276 = arith.subf %275, %272 : vector<18x64xf32>
    %277 = arith.select %274, %272, %276 : vector<18x64xi1>, vector<18x64xf32>
    %cst_86 = arith.constant 1.000000e+00 : f32
    %278 = vector.broadcast %cst_86 : f32 to vector<18x64xf32>
    %279 = arith.addf %278, %277 : vector<18x64xf32>
    %280 = arith.mulf %242, %279 : vector<18x64xf32>
    %281 = arith.index_cast %arg1 : i32 to index
    %c0_87 = arith.constant 0 : index
    %c0_88 = arith.constant 0 : index
    %282 = vector.load %arg12[%281, %c0_87, %c0_88] : memref<3x32x64xbf16, #tpu.memory_space<vmem>>, vector<1x32x64xbf16>
    %283 = vector.shape_cast %282 : vector<1x32x64xbf16> to vector<32x64xbf16>
    %284 = arith.truncf %280 : vector<18x64xf32> to vector<18x64xbf16>
    %cst_89 = arith.constant dense<0.000000e+00> : vector<18x32xf32>
    %285 = tpu.matmul %284, %283, %cst_89 {dimension_numbers = #tpu.dot_dimension_numbers<[1], [1], [0], [0], [0, 0, 1, 0], [], []>} : vector<18x64xbf16>, vector<32x64xbf16>, vector<18x32xf32> -> vector<18x32xf32>
    %286 = vector.broadcast %21 : vector<1x32xf32> to vector<18x32xf32>
    %287 = arith.addf %285, %286 : vector<18x32xf32>
    %288 = arith.addf %287, %184 : vector<18x32xf32>
    %cst_90 = arith.constant dense<0.000000e+00> : vector<18xf32>
    %289 = vector.multi_reduction <add>, %288, %cst_90 [1] : vector<18x32xf32> to vector<18xf32>
    %290 = vector.shape_cast %289 : vector<18xf32> to vector<18x1xf32>
    %cst_91 = arith.constant 3.200000e+01 : f32
    %291 = vector.broadcast %cst_91 : f32 to vector<18x1xf32>
    %292 = arith.divf %290, %291 : vector<18x1xf32>
    %293 = vector.broadcast %292 : vector<18x1xf32> to vector<18x32xf32>
    %294 = arith.subf %288, %293 : vector<18x32xf32>
    %295 = arith.mulf %294, %294 : vector<18x32xf32>
    %cst_92 = arith.constant dense<0.000000e+00> : vector<18xf32>
    %296 = vector.multi_reduction <add>, %295, %cst_92 [1] : vector<18x32xf32> to vector<18xf32>
    %297 = vector.shape_cast %296 : vector<18xf32> to vector<18x1xf32>
    %cst_93 = arith.constant 3.200000e+01 : f32
    %298 = vector.broadcast %cst_93 : f32 to vector<18x1xf32>
    %299 = arith.divf %297, %298 : vector<18x1xf32>
    %cst_94 = arith.constant 9.99999974E-6 : f32
    %300 = vector.broadcast %cst_94 : f32 to vector<18x1xf32>
    %301 = arith.addf %299, %300 : vector<18x1xf32>
    %302 = math.rsqrt %301 : vector<18x1xf32>
    %303 = vector.broadcast %302 : vector<18x1xf32> to vector<18x32xf32>
    %304 = arith.mulf %294, %303 : vector<18x32xf32>
    %305 = vector.broadcast %19 : vector<1x32xf32> to vector<18x32xf32>
    %306 = arith.mulf %304, %305 : vector<18x32xf32>
    %307 = vector.broadcast %20 : vector<1x32xf32> to vector<18x32xf32>
    %308 = arith.addf %306, %307 : vector<18x32xf32>
    %c0_95 = arith.constant 0 : index
    %c0_96 = arith.constant 0 : index
    %309 = vector.load %arg14[%c0_95, %c0_96] : memref<18x32xf32, #tpu.memory_space<vmem>>, vector<18x32xf32>
    tpu.vector_store %arg14[%c0_95, %c0_96], %308 {strides = array<i32>} : memref<18x32xf32, #tpu.memory_space<vmem>>, vector<18x32xf32>,
    %c2_i32 = arith.constant 2 : i32
    %310 = arith.cmpi eq, %arg1, %c2_i32 : i32
    %311 = arith.extui %310 : i1 to i32
    %c0_i32_97 = arith.constant 0 : i32
    %312 = arith.cmpi ne, %311, %c0_i32_97 : i32
    scf.if %312 {
      %313 = vector.extract_strided_slice %308 {offsets = [0, 0], sizes = [1, 32], strides = [1, 1]} : vector<18x32xf32> to vector<1x32xf32>
      %314 = vector.extract_strided_slice %308 {offsets = [9, 0], sizes = [1, 32], strides = [1, 1]} : vector<18x32xf32> to vector<1x32xf32>
      %315 = tpu.concatenate %313, %314 in 0 : vector<1x32xf32>, vector<1x32xf32> -> vector<2x32xf32>
      %c0_98 = arith.constant 0 : index
      %c0_99 = arith.constant 0 : index
      %c0_100 = arith.constant 0 : index
      %316 = vector.load %arg13[%c0_98, %c0_99, %c0_100] : memref<1x2x32xf32, #tpu.memory_space<vmem>>, vector<1x2x32xf32>
      %317 = vector.shape_cast %316 : vector<1x2x32xf32> to vector<2x32xf32>
      %318 = vector.shape_cast %315 : vector<2x32xf32> to vector<1x2x32xf32>
      tpu.vector_store %arg13[%c0_98, %c0_99, %c0_100], %318 {strides = array<i32>} : memref<1x2x32xf32, #tpu.memory_space<vmem>>, vector<1x2x32xf32>,
    } else {
    }
    return
  }
  func.func @transform_0(%arg0: i32, %arg1: i32) -> (i32, i32, i32, i32) {
    %c0_i32 = arith.constant 0 : i32
    %c0_i32_0 = arith.constant 0 : i32
    %c0_i32_1 = arith.constant 0 : i32
    %c0_i32_2 = arith.constant 0 : i32
    return %arg0, %c0_i32, %c0_i32_0, %c0_i32_1 : i32, i32, i32, i32
  }
  func.func @transform_1(%arg0: i32, %arg1: i32) -> (i32, i32) {
    %c0_i32 = arith.constant 0 : i32
    %c0_i32_0 = arith.constant 0 : i32
    %c0_i32_1 = arith.constant 0 : i32
    return %c0_i32, %c0_i32_0 : i32, i32
  }
  func.func @transform_2(%arg0: i32, %arg1: i32) -> (i32, i32) {
    %c0_i32 = arith.constant 0 : i32
    %c0_i32_0 = arith.constant 0 : i32
    %c0_i32_1 = arith.constant 0 : i32
    return %c0_i32, %c0_i32_0 : i32, i32
  }
  func.func @transform_3(%arg0: i32, %arg1: i32) -> (i32, i32, i32) {
    %c0_i32 = arith.constant 0 : i32
    %c0_i32_0 = arith.constant 0 : i32
    %c0_i32_1 = arith.constant 0 : i32
    %c0_i32_2 = arith.constant 0 : i32
    return %c0_i32, %c0_i32_0, %c0_i32_1 : i32, i32, i32
  }
  func.func @transform_4(%arg0: i32, %arg1: i32) -> (i32, i32, i32) {
    %c0_i32 = arith.constant 0 : i32
    %c0_i32_0 = arith.constant 0 : i32
    %c0_i32_1 = arith.constant 0 : i32
    %c0_i32_2 = arith.constant 0 : i32
    return %c0_i32, %c0_i32_0, %c0_i32_1 : i32, i32, i32
  }
  func.func @transform_5(%arg0: i32, %arg1: i32) -> (i32, i32, i32) {
    %c0_i32 = arith.constant 0 : i32
    %c0_i32_0 = arith.constant 0 : i32
    %c0_i32_1 = arith.constant 0 : i32
    %c0_i32_2 = arith.constant 0 : i32
    return %c0_i32, %c0_i32_0, %c0_i32_1 : i32, i32, i32
  }
  func.func @transform_6(%arg0: i32, %arg1: i32) -> (i32, i32, i32) {
    %c0_i32 = arith.constant 0 : i32
    %c0_i32_0 = arith.constant 0 : i32
    %c0_i32_1 = arith.constant 0 : i32
    %c0_i32_2 = arith.constant 0 : i32
    return %c0_i32, %c0_i32_0, %c0_i32_1 : i32, i32, i32
  }
  func.func @transform_7(%arg0: i32, %arg1: i32) -> (i32, i32, i32) {
    %c0_i32 = arith.constant 0 : i32
    %c0_i32_0 = arith.constant 0 : i32
    %c0_i32_1 = arith.constant 0 : i32
    %c0_i32_2 = arith.constant 0 : i32
    return %c0_i32, %c0_i32_0, %c0_i32_1 : i32, i32, i32
  }
  func.func @transform_8(%arg0: i32, %arg1: i32) -> (i32, i32, i32) {
    %c0_i32 = arith.constant 0 : i32
    %c0_i32_0 = arith.constant 0 : i32
    %c0_i32_1 = arith.constant 0 : i32
    %c0_i32_2 = arith.constant 0 : i32
    return %c0_i32, %c0_i32_0, %c0_i32_1 : i32, i32, i32
  }
  func.func @transform_9(%arg0: i32, %arg1: i32) -> (i32, i32, i32) {
    %c0_i32 = arith.constant 0 : i32
    %c0_i32_0 = arith.constant 0 : i32
    %c0_i32_1 = arith.constant 0 : i32
    %c0_i32_2 = arith.constant 0 : i32
    return %c0_i32, %c0_i32_0, %c0_i32_1 : i32, i32, i32
  }
  func.func @transform_10(%arg0: i32, %arg1: i32) -> (i32, i32, i32) {
    %c0_i32 = arith.constant 0 : i32
    %c0_i32_0 = arith.constant 0 : i32
    %c0_i32_1 = arith.constant 0 : i32
    %c0_i32_2 = arith.constant 0 : i32
    return %c0_i32, %c0_i32_0, %c0_i32_1 : i32, i32, i32
  }
  func.func @transform_11(%arg0: i32, %arg1: i32) -> (i32, i32, i32) {
    %c0_i32 = arith.constant 0 : i32
    %c0_i32_0 = arith.constant 0 : i32
    %c0_i32_1 = arith.constant 0 : i32
    return %arg0, %c0_i32, %c0_i32_0 : i32, i32, i32
  }
}

</mosaic_0001>

<bundles_post_ra>
// kernel: tpu_custom_call.1
= control target key start
LH: loop header
LB: loop body
LE: loop exit
PB: predicated region body
PF: predicated region fallthrough
CT: control target
= control target key end

     0   :  { %16 = vsyncpa [#allocation4], 0  ;;  %s2573_s17 = smov 0   ;;  %s2575_s18 = smov 0   ;;  %s3118_s0 = inlined_call_operand.vmem [shape: f32[1,2,8,32], index: 0, kind: input, shape index: {}]   ;;  %s3119_s1 = inlined_call_operand.vmem [shape: f32[1,32], index: 1, kind: input, shape index: {}]   ;;  %s3120_s2 = inlined_call_operand.vmem [shape: f32[9,32], index: 2, kind: input, shape index: {}]   ;;  %s3121_s3 = inlined_call_operand.vmem [shape: bf16[3,96,32], index: 3, kind: input, shape index: {}]   ;;  %s3122_s4 = inlined_call_operand.vmem [shape: f32[3,1,96], index: 4, kind: input, shape index: {}]   ;;  %s3123_s5 = inlined_call_operand.vmem [shape: bf16[3,32,32], index: 5, kind: input, shape index: {}]   ;;  %s3124_s6 = inlined_call_operand.vmem [shape: f32[3,6,32], index: 6, kind: input, shape index: {}]   ;;  %s3125_s7 = inlined_call_operand.vmem [shape: f32[3,2,64], index: 7, kind: input, shape index: {}]   ;;  %s3126_s8 = inlined_call_operand.vmem [shape: bf16[3,64,32], index: 8, kind: input, shape index: {}]   ;;  %s3127_s9 = inlined_call_operand.vmem [shape: bf16[3,64,64], index: 9, kind: input, shape index: {}]   ;;  %s3128_s10 = inlined_call_operand.vmem [shape: bf16[3,32,64], index: 10, kind: input, shape index: {}]   ;;  %s3129_s11 = inlined_call_operand.hbm [shape: f32[1,2,32], index: 11, kind: output, shape index: {}]  }
   0x1   :  { %s2577_s19 = smov 0  }
   0x2 LB: > { %s2132_s20 = sadd.s32 4294967295, %s2494_s19   ;;  %s31_s21 = sadd.s32 1, %s2490_s18  ;;  %s2494_s19 = sphi %s2577_s19, %s22_s19   ;;  %s2490_s18 = sphi %s2575_s18, %s3145_s18   ;;  %s2486_s17 = sphi %s2573_s17, %s3144_s17  }
   0x3   : > { %p32_p0 = scmp.ge.s32.totalorder %s31_s21, 3  ;;  %p2135_p1 = scmp.ge.s32.totalorder %s2494_s19, 1 }
   0x4   : > { %p350_p2 = scmp.lt.s32.totalorder %s2494_s19, 4 }
   0x5   : > { %s3147_s21 = smov (%p32_p0, %s31_s21), 0 }
   0x6   : > { %p351_p3 = pnand %p2135_p1, %p350_p2 }
   0x7   : > { %p2136_p4 = scmp.ne.s32.totalorder (!%p351_p3), %s2486_s17, 0 }
   0x8   : > { %354 = sbr.rel (%p351_p3) target bundleno = 3593 (0xe09), region = 64 }
   0xd   : > { %394 = sbr.rel (%p2136_p4) target bundleno = 29 (0x1d), region = 68 }
  0x12   : > { %v397_v0 = vld [vmem:[%s3119_s1] sm:$0x1]  ;;  %vm402_vm0 = vcmask 1040384   ;;  %v2137_v3 = vld [vmem:[%s3118_s0 + $0x8] sm:$0xff]  ;;  %vm422_vm1 = vcmask 261120   ;;  %vm425_vm2 = vcmask 254976  }
  0x13   : > { %v398_v1 = vld [vmem:[%s3118_s0] sm:$0xff]  ;;  %v396_v4 = vld [vmem:[%s3120_s2 + $0x8] sm:$0x1]  ;;  %v409_v6 = vrot.slane %v2137_v3, 7 }
  0x14   : > { %v400_v2 = vrot.slane %v398_v1, 7  ;;  %v395_v5 = vld [vmem:[%s3120_s2] sm:$0xff] }
  0x15   : > { %v411_v9 = vsel %vm402_vm0, %v397_v0, %v409_v6  ;;  %v413_v10 = vadd.f32 %v409_v6, %v396_v4 }
  0x16   : > { %v403_v7 = vsel %vm402_vm0, %v397_v0, %v400_v2  ;;  %v412_v11 = vadd.f32 %v411_v9, %v395_v5  ;;  %v405_v12 = vadd.f32 %v400_v2, %v396_v4 }
  0x17   : > { %v404_v8 = vadd.f32 %v403_v7, %v395_v5  ;;  %v417_v13 = vrot.slane %v413_v10, 7 }
  0x18   : > { %v416_v14 = vrot.slane %v412_v11, 7 }
  0x19   : > { %423 = vst.msk [vmem:[#allocation2] sm:$0xff] %vm422_vm1, %v404_v8 }
  0x1a   : > { %v421_v15 = vsel %vm402_vm0, %v405_v12, %v416_v14  ;;  %v418_v16 = vsel %vm402_vm0, %v416_v14, %v417_v13 }
  0x1b   : > { %424 = vst.msk [vmem:[#allocation2 + $0x8] sm:$0xff] %vm422_vm1, %v421_v15 }
  0x1c   : > { %426 = vst.msk [vmem:[#allocation2 + $0x10] sm:$0x3] %vm425_vm2, %v418_v16 }
  0x1d PF: > { %s2249_s13 = smul.u32 48, %s2486_s17  ;;  %s445_s16 = scalar_lea.vmem %s3122_s4, %s2486_s17  ;;  %vm495_vm3 = vcmask 261120   ;;  %vm559_vm4 = vcmask 64512   ;;  %vm580_vm5 = vcmask 72704   ;;  %vm584_vm6 = vcmask 65536  }
  0x1e   : > { %v2334_v34 = vld [vmem:[%s445_s16] ss:$0 sm:$0xff]  ;;  %s2496_s25 = smov 96   ;;  %s2497_s26 = smov 120   ;;  %vm636_vm7 = vcmask 1043456   ;;  %vm637_vm8 = vcmask 1044480  }
  0x1f   : > { %s432_s24 = scalar_lea.vmem %s3121_s3, %s2249_s13  ;;  %s2498_s27 = smov 88  }
  0x20   : > { %v2255_v17 = vld [vmem:[%s432_s24 + $0x28] sm:$0xff]  ;;  %v2254_v19 = vld [vmem:[%s432_s24 + $0x20] sm:$0xff]  ;;  %v2253_v21 = vld [vmem:[%s432_s24 + $0x18] sm:$0xff]  ;;  %s2499_s28 = smov 56   ;;  %s2500_s29 = smov 72  }
  0x21   : > { %v518_v18 = vsel %vm495_vm3, %v2255_v17, 0  ;;  %v515_v20 = vsel %vm495_vm3, %v2254_v19, 0  ;;  %v512_v22 = vsel %vm495_vm3, %v2253_v21, 0  ;;  %v2252_v23 = vld [vmem:[%s432_s24 + $0x10] sm:$0xff]  ;;  %v2251_v25 = vld [vmem:[%s432_s24 + $0x8] sm:$0xff]  ;;  %v2250_v27 = vld [vmem:[%s432_s24] sm:$0xff] }
  0x22   : > { %522 = vmatpush.bf16.xpose.msra.mxu0 %v518_v18  ;;  %v509_v24 = vsel %vm495_vm3, %v2252_v23, 0  ;;  %v506_v26 = vsel %vm495_vm3, %v2251_v25, 0  ;;  %v503_v28 = vsel %vm495_vm3, %v2250_v27, 0  ;;  %v427_v29 = vld [vmem:[#allocation2] sm:$0xff]  ;;  %v428_v30 = vld [vmem:[#allocation2 + $0x8] sm:$0xff]  ;;  %s2501_s30 = smov 80  }
  0x23   : > { %v460_v31 = vpack.c.bf16 %v428_v30, %v427_v29  ;;  %v429_v32 = vld [vmem:[#allocation2 + $0x10] sm:$0x3]  ;;  %s2502_s12 = smov 104   ;;  %s2503_s13 = smov 64  }
  0x24   : > { %v461_v33 = vpack.c.bf16 %v429_v32, %v429_v32  ;;  %s2504_s14 = smov 112   ;;  %s2506_s15 = smov 48  }
  0x25   : > { %s2507_s16 = smov 40   ;;  %s2508_s22 = smov 8  }
  0x26   : > { %s2509_s23 = smov 16   ;;  %s2510_s24 = smov 24  }
  0x27   : > { %p2244_p5 = scmp.ne.s32.totalorder %s2486_s17, 2 }
  0x2a   : > { %523 = vmatpush.bf16.xpose.msra.mxu0 %v515_v20 }
  0x32   : > { %524 = vmatpush.bf16.xpose.msra.mxu0 %v512_v22 }
  0x3a   : > { %525 = vmatpush.bf16.xpose.msra.mxu0 %v509_v24 }
  0x42   : > { %526 = vmatpush.bf16.xpose.msra.mxu0 %v506_v26 }
  0x4a   : > { %527 = vmatpush.bf16.xpose.msra.mxu0 %v503_v28 }
  0x51   : > { %2167 = vmatmul.msk.bf16.vlgmr.msra.gmra.mxu0 %vm495_vm3, %v460_v31 }
  0x61   : > { %2168 = vmatmul.msk.bf16.gmra.mxu0 %vm495_vm3, %v461_v33 }
  0xce   : > { %v529_v35 = vpop.f32.mrf.mxu0 }
  0xcf   : > { %v530_v36 = vadd.f32 %v2334_v34, %v529_v35 }
  0xd1   : > { %v538_v37 = vmul.f32 0.35355338, %v530_v36  ;;  %v544_v39 = vpack.c.bf16 %v530_v36, %v530_v36  ;;  %v2505_v36 = vmov 65535  }
  0xd3   : > { %v541_v41 = vpack.c.bf16 %v538_v37, %v538_v37  ;;  %v554_v44 = vunpack.c.l.b16 %v544_v39  ;;  %v638_v37 = vsel %vm636_vm7, 4294967295, %v2505_v36 }
  0xd5   : > { %v549_v47 = vunpack.c.l.b16 %v541_v41 }
  0xd6   : > { %v531_v38 = vpop.f32.mrf.mxu0 }
  0xd7   : > { %v532_v40 = vadd.f32 %v2334_v34, %v531_v38 }
  0xd9   : > { %v539_v42 = vmul.f32 0.35355338, %v532_v40  ;;  %v545_v43 = vpack.c.bf16 %v532_v40, %v532_v40  ;;  %v2680_v40 = vsel %vm637_vm8, %v638_v37, 0 }
  0xdb   : > { %v542_v45 = vpack.c.bf16 %v539_v42, %v539_v42  ;;  %v555_v46 = vunpack.c.l.b16 %v545_v43 }
  0xdd   : > { %v550_v48 = vunpack.c.l.b16 %v542_v45  ;;  %v2630_v49 = vpack.c.b16 %v555_v46, %v554_v44 }
  0xde   : > { %v534_v50 = vpop.f32.mrf.mxu0 }
  0xdf   : > { %v2632_v51 = vpack.c.b16 %v550_v48, %v549_v47  ;;  %v535_v52 = vadd.f32 %v2334_v34, %v534_v50  ;;  %557 = vrot.lane.b32.xlu0 %v2630_v49, %s2496_s25 }
  0xe1   : > { %v540_v53 = vmul.f32 0.35355338, %v535_v52  ;;  %v546_v54 = vpack.c.bf16 %v535_v52, %v535_v52  ;;  %657 = vrot.lane.b32.xlu1 %v2632_v51, %s2497_s26 }
  0xe3   : > { %v543_v55 = vpack.c.bf16 %v540_v53, %v540_v53  ;;  %v985_v56 = vunpack.c.l.b16 %v546_v54 }
  0xe5   : > { %v975_v57 = vunpack.c.l.b16 %v543_v55  ;;  %v2638_v58 = vpack.c.b16 %v985_v56, %v555_v46 }
  0xe6   : > { %v536_v59 = vpop.f32.mrf.mxu0 }
  0xe7   : > { %v2640_v60 = vpack.c.b16 %v975_v57, %v550_v48  ;;  %659 = vrot.lane.b32.xlu0 %v2630_v49, %s2498_s27 }
 0x151   : > { %v558_v61 = vpop.permute.xlu0 %557 }
 0x152   : > { %v564_v62 = vsel %vm559_vm4, %v558_v61, 0 }
 0x153   : > { %573 = vmatpush.bf16.xpose.msra.mxu1 %v564_v62  ;;  %v658_v1 = vpop.permute.xlu1 %657 }
 0x159   : > { %v660_v63 = vpop.permute.xlu0 %659 }
 0x15a   : > { %2169 = vmatmul.msk.bf16.vlgmr.msra.gmra.mxu1 %vm559_vm4, %v2632_v51  ;;  %v665_v0 = vsel %vm559_vm4, %v660_v63, 0 }
 0x15b   : > { %674 = vmatpush.bf16.xpose.msra.mxu3 %v665_v0 }
 0x162   : > { %2171 = vmatmul.msk.bf16.vlgmr.msra.gmra.mxu3 %vm559_vm4, %v658_v1 }
 0x1d7   : > { %v575_v2 = vpop.f32.mrf.mxu1 }
 0x1d8   : > { %v581_v3 = vsel %vm580_vm5, %v575_v2, -inf }
 0x1d9   : > { %582 = vmax.xlane.f32.xlu1 %v581_v3 }
 0x1df   : > { %v577_v6 = vpop.f32.mrf.mxu1 }
 0x1e0   : > { %v585_v9 = vsel %vm584_vm6, %v577_v6, -inf }
 0x1e5   : > { %v676_v4 = vpop.f32.mrf.mxu3 }
 0x1e6   : > { %v681_v5 = vsel %vm580_vm5, %v676_v4, -inf }
 0x1e7   : > { %682 = vmax.xlane.f32.xlu2 %v681_v5 }
 0x1ed   : > { %v678_v7 = vpop.f32.mrf.mxu3 }
 0x1ee   : > { %v684_v8 = vsel %vm584_vm6, %v678_v7, -inf }
 0x1ef   : > { %685 = vmax.xlane.f32.xlu0 %v684_v8  ;;  %586 = vmax.xlane.f32.xlu2 %v585_v9 }
 0x1f2   : > { %730 = vrot.lane.b32.xlu1 %v2630_v49, %s2499_s28 }
 0x1fa   : > { %849 = vrot.lane.b32.xlu1 %v2630_v49, %s2500_s29 }
 0x203   : > { %754 = vrot.lane.b32.xlu0 %v2630_v49, %s2501_s30 }
 0x20b   : > { %847 = vrot.lane.b32.xlu0 %v2632_v51, %s2502_s12 }
 0x24c   : > { %v583_v10 = vpop.xlane.xlu1 %582 }
 0x24d   : > { %v588_v11 = vsub.f32 %v575_v2, %v583_v10 }
 0x24f   : > { %v590_v12 = vmul.f32 1.442695, %v588_v11 }
 0x251   : > { %2335 = vpow2.f32 %v590_v12 }
 0x257   : > { %v2661_v13 = vpop.eup %2335 }
 0x258   : > { %v594_v14 = vsel %vm580_vm5, %v2661_v13, 0.0 }
 0x259   : > { %595 = vadd.xlane.f32.xlu2 %v594_v14 }
 0x25a   : > { %v683_v15 = vpop.xlane.xlu2 %682 }
 0x25b   : > { %v687_v16 = vsub.f32 %v676_v4, %v683_v15 }
 0x25d   : > { %v689_v17 = vmul.f32 1.442695, %v687_v16 }
 0x25f   : > { %2337 = vpow2.f32 %v689_v17 }
 0x262   : > { %v587_v18 = vpop.xlane.xlu2 %586  ;;  %v686_v25 = vpop.xlane.xlu0 %685 }
 0x263   : > { %v589_v19 = vsub.f32 %v577_v6, %v587_v18  ;;  %v688_v26 = vsub.f32 %v678_v7, %v686_v25 }
 0x264   : > { %v731_v41 = vpop.permute.xlu1 %730 }
 0x265   : > { %v2665_v20 = vpop.eup %2337  ;;  %v592_v21 = vmul.f32 1.442695, %v589_v19  ;;  %v691_v27 = vmul.f32 1.442695, %v688_v26  ;;  %v736_v47 = vand.u32 %v731_v41, %v2680_v40 }
 0x266   : > { %v693_v22 = vsel %vm580_vm5, %v2665_v20, 0.0 }
 0x267   : > { %694 = vadd.xlane.f32.xlu2 %v693_v22  ;;  %2339 = vpow2.f32 %v592_v21 }
 0x268   : > { %2341 = vpow2.f32 %v691_v27 }
 0x26d   : > { %v2340_v23 = vpop.eup %2339 }
 0x26e   : > { %v597_v24 = vsel %vm584_vm6, %v2340_v23, 0.0  ;;  %v2672_v28 = vpop.eup %2341 }
 0x26f   : > { %598 = vadd.xlane.f32.xlu2 %v597_v24  ;;  %v696_v29 = vsel %vm584_vm6, %v2672_v28, 0.0 }
 0x275   : > { %v755_v1 = vpop.permute.xlu0 %754 }
 0x276   : > { %v760_v3 = vsel %vm559_vm4, %v755_v1, 0  ;;  %v990_v1 = vshll.u32 %v2638_v58, 16 }
 0x287   : > { %631 = vrot.lane.b32.xlu2 %v2630_v49, %s2503_s13 }
 0x2b0   : > { %697 = vadd.xlane.f32.xlu2 %v696_v29  ;;  %v850_v29 = vpop.permute.xlu1 %849 }
 0x2c8   : > { %752 = vrot.lane.b32.xlu2 %v2632_v51, %s2504_s14 }
 0x2cc   : > { %v596_v30 = vpop.xlane.xlu2 %595 }
 0x2cd   : > { %2343 = vrcp.f32 %v596_v30  ;;  %v611_v45 = vand.u32 2147483648, %v596_v30  ;;  %vm605_vm10 = vweird.f32 %v596_v30  ;;  %v609_v48 = vand.u32 2147483647, %v596_v30 }
 0x2cf   : > { %v612_v55 = vor.u32 1.1754944e-38, %v611_v45  ;;  %vm610_vm13 = vcmp.eq.f32.partialorder %v609_v48, 8.507059e+37 }
 0x2d3   : > { %v2344_v32 = vpop.eup %2343 }
 0x2d4   : > { %v601_v33 = vmul.f32 %v2344_v32, %v596_v30  ;;  %vm606_vm9 = vweird.f32 %v2344_v32 }
 0x2d5   : > { %vm607_vm11 = vmor %vm605_vm10, %vm606_vm9 }
 0x2d6   : > { %v602_v34 = vsub.f32 1.0, %v601_v33  ;;  %v848_v33 = vpop.permute.xlu0 %847 }
 0x2d8   : > { %v603_v38 = vmul.f32 %v2344_v32, %v602_v34 }
 0x2da   : > { %v2678_v31 = vpop.xlane.xlu2 %694  ;;  %v604_v42 = vadd.f32 %v2344_v32, %v603_v38 }
 0x2db   : > { %v710_v12 = vand.u32 2147483648, %v2678_v31  ;;  %vm704_vm2 = vweird.f32 %v2678_v31 }
 0x2dc   : > { %v608_v54 = vsel %vm607_vm11, %v2344_v32, %v604_v42 }
 0x2dd   : > { %v613_v59 = vsel %vm610_vm13, %v612_v55, %v608_v54  ;;  %v711_v19 = vor.u32 1.1754944e-38, %v710_v12 }
 0x2de   : > { %v614_v63 = vmul.f32 %v2661_v13, %v613_v59  ;;  %v708_v13 = vand.u32 2147483647, %v2678_v31 }
 0x2e0   : > { %vm709_vm9 = vcmp.eq.f32.partialorder %v708_v13, 8.507059e+37  ;;  %v978_v13 = vshrl.u32 %v2640_v60, 16 }
 0x2e2   : > { %v599_v35 = vpop.xlane.xlu2 %598 }
 0x2e3   : > { %2345 = vrcp.f32 %v599_v35  ;;  %v626_v51 = vand.u32 2147483648, %v599_v35  ;;  %v624_v53 = vand.u32 2147483647, %v599_v35  ;;  %vm620_vm14 = vweird.f32 %v599_v35 }
 0x2e4   : > { %2347 = vrcp.f32 %v2678_v31 }
 0x2e5   : > { %v627_v57 = vor.u32 1.1754944e-38, %v626_v51  ;;  %vm625_vm0 = vcmp.eq.f32.partialorder %v624_v53, 8.507059e+37 }
 0x2e9   : > { %v2346_v39 = vpop.eup %2345 }
 0x2ea   : > { %v616_v43 = vmul.f32 %v2346_v39, %v599_v35  ;;  %v632_v44 = vpop.permute.xlu2 %631  ;;  %vm621_vm12 = vweird.f32 %v2346_v39  ;;  %v2348_v4 = vpop.eup %2347 }
 0x2eb   : > { %v641_v46 = vand.u32 %v2680_v40, %v632_v44  ;;  %vm622_vm15 = vmor %vm620_vm14, %vm621_vm12  ;;  %v700_v5 = vmul.f32 %v2348_v4, %v2678_v31  ;;  %vm705_vm1 = vweird.f32 %v2348_v4  ;;  %v855_v31 = vsel %vm559_vm4, %v850_v29, 0 }
 0x2ec   : > { %v617_v50 = vsub.f32 1.0, %v616_v43  ;;  %vm706_vm7 = vmor %vm704_vm2, %vm705_vm1 }
 0x2ed   : > { %650 = vmatpush.bf16.msra.mxu2 %v641_v46  ;;  %v701_v6 = vsub.f32 1.0, %v700_v5  ;;  %v992_v5 = vrot.slane %v990_v1, 1 }
 0x2ee   : > { %v618_v52 = vmul.f32 %v2346_v39, %v617_v50 }
 0x2ef   : > { %v702_v8 = vmul.f32 %v2348_v4, %v701_v6 }
 0x2f0   : > { %v619_v56 = vadd.f32 %v2346_v39, %v618_v52 }
 0x2f1   : > { %745 = vmatpush.bf16.msrb.mxu2 %v736_v47  ;;  %v703_v10 = vadd.f32 %v2348_v4, %v702_v8 }
 0x2f2   : > { %v623_v61 = vsel %vm622_vm15, %v2346_v39, %v619_v56 }
 0x2f3   : > { %v628_v62 = vsel %vm625_vm0, %v627_v57, %v623_v61  ;;  %v707_v16 = vsel %vm706_vm7, %v2348_v4, %v703_v10 }
 0x2f4   : > { %v629_v0 = vmul.f32 %v2340_v23, %v628_v62  ;;  %v712_v23 = vsel %vm709_vm9, %v711_v19, %v707_v16 }
 0x2f5   : > { %v713_v26 = vmul.f32 %v2665_v20, %v712_v23 }
 0x2f6   : > { %v630_v2 = vpack.c.bf16 %v629_v0, %v614_v63 }
 0x2f8   : > { %2170 = vmatmul.msk.bf16.vlgmr.msra.gmra.mxu2 %vm580_vm5, %v630_v2 }
 0x2f9   : > { %769 = vmatpush.bf16.xpose.msra.mxu2 %v760_v3 }
 0x323   : > { %v698_v7 = vpop.xlane.xlu2 %697 }
 0x324   : > { %2349 = vrcp.f32 %v698_v7  ;;  %v725_v15 = vand.u32 2147483648, %v698_v7  ;;  %v723_v18 = vand.u32 2147483647, %v698_v7  ;;  %vm719_vm10 = vweird.f32 %v698_v7 }
 0x326   : > { %v726_v22 = vor.u32 1.1754944e-38, %v725_v15  ;;  %vm724_vm12 = vcmp.eq.f32.partialorder %v723_v18, 8.507059e+37 }
 0x32a   : > { %v2350_v9 = vpop.eup %2349 }
 0x32b   : > { %v715_v11 = vmul.f32 %v2350_v9, %v698_v7  ;;  %vm720_vm8 = vweird.f32 %v2350_v9  ;;  %v753_v32 = vpop.permute.xlu2 %752 }
 0x32c   : > { %vm721_vm11 = vmor %vm719_vm10, %vm720_vm8 }
 0x32d   : > { %v716_v14 = vsub.f32 1.0, %v715_v11  ;;  %v980_v11 = vshll.u32 %v2640_v60, 16 }
 0x32f   : > { %v717_v17 = vmul.f32 %v2350_v9, %v716_v14  ;;  %v982_v12 = vrot.slane %v980_v11, 1 }
 0x331   : > { %v718_v21 = vadd.f32 %v2350_v9, %v717_v17  ;;  %v2740_v14 = vor.u32 %v982_v12, %v978_v13 }
 0x333   : > { %v722_v24 = vsel %vm721_vm11, %v2350_v9, %v718_v21  ;;  %v988_v9 = vshrl.u32 %v2638_v58, 16 }
 0x334   : > { %v727_v25 = vsel %vm724_vm12, %v726_v22, %v722_v24 }
 0x335   : > { %v728_v27 = vmul.f32 %v2672_v28, %v727_v25  ;;  %v2734_v10 = vor.u32 %v992_v5, %v988_v9 }
 0x337   : > { %v729_v30 = vpack.c.bf16 %v728_v27, %v713_v26 }
 0x339   : > { %2172 = vmatmul.msk.bf16.vlgmr.msrb.gmra.mxu2 %vm580_vm5, %v729_v30 }
 0x33a   : > { %864 = vmatpush.bf16.xpose.msrb.mxu2 %v855_v31 }
 0x349   : > { %2173 = vmatmul.msk.bf16.vlgmr.msra.gmra.mxu2 %vm559_vm4, %v753_v32 }
 0x359   : > { %2175 = vmatmul.msk.bf16.vlgmr.msrb.gmra.mxu2 %vm559_vm4, %v848_v33 }
 0x37b   : > { %v2698_v34 = vpop.f32.mrf.mxu2 }
 0x383   : > { %v2700_v35 = vpop.f32.mrf.mxu2 }
 0x3bc   : > { %v2702_v20 = vpop.f32.mrf.mxu2 }
 0x3c4   : > { %v2704_v28 = vpop.f32.mrf.mxu2 }
 0x3cc   : > { %v771_v36 = vpop.f32.mrf.mxu2 }
 0x3cd   : > { %v776_v37 = vsel %vm580_vm5, %v771_v36, -inf }
 0x3ce   : > { %777 = vmax.xlane.f32.xlu2 %v776_v37 }
 0x3d4   : > { %v773_v38 = vpop.f32.mrf.mxu2 }
 0x3d5   : > { %v779_v39 = vsel %vm584_vm6, %v773_v38, -inf }
 0x3d6   : > { %780 = vmax.xlane.f32.xlu1 %v779_v39 }
 0x3dc   : > { %v866_v41 = vpop.f32.mrf.mxu2 }
 0x3dd   : > { %v871_v42 = vsel %vm580_vm5, %v866_v41, -inf }
 0x3de   : > { %872 = vmax.xlane.f32.xlu0 %v871_v42 }
 0x3e4   : > { %v868_v43 = vpop.f32.mrf.mxu2 }
 0x3e5   : > { %v874_v44 = vsel %vm584_vm6, %v868_v43, -inf }
 0x3e6   : > { %875 = vmax.xlane.f32.xlu2 %v874_v44 }
 0x3f2   : > { %825 = vrot.lane.b32.xlu0 %v2630_v49, %s2506_s15 }
 0x3fe   : > { %920 = vrot.lane.b32.xlu2 %v2630_v49, %s2507_s16 }
 0x441   : > { %v778_v45 = vpop.xlane.xlu2 %777 }
 0x442   : > { %v782_v46 = vsub.f32 %v771_v36, %v778_v45 }
 0x444   : > { %v784_v47 = vmul.f32 1.442695, %v782_v46 }
 0x446   : > { %2351 = vpow2.f32 %v784_v47 }
 0x449   : > { %v781_v48 = vpop.xlane.xlu1 %780 }
 0x44a   : > { %v783_v50 = vsub.f32 %v773_v38, %v781_v48 }
 0x44c   : > { %v2714_v51 = vpop.eup %2351  ;;  %v786_v52 = vmul.f32 1.442695, %v783_v50 }
 0x44d   : > { %v788_v53 = vsel %vm580_vm5, %v2714_v51, 0.0 }
 0x44e   : > { %2353 = vpow2.f32 %v786_v52  ;;  %789 = vadd.xlane.f32.xlu1 %v788_v53 }
 0x451   : > { %v873_v54 = vpop.xlane.xlu0 %872 }
 0x452   : > { %v877_v55 = vsub.f32 %v866_v41, %v873_v54 }
 0x454   : > { %v2718_v56 = vpop.eup %2353  ;;  %v879_v57 = vmul.f32 1.442695, %v877_v55 }
 0x455   : > { %v791_v49 = vsel %vm584_vm6, %v2718_v56, 0.0 }
 0x456   : > { %2355 = vpow2.f32 %v879_v57  ;;  %792 = vadd.xlane.f32.xlu0 %v791_v49 }
 0x459   : > { %v876_v59 = vpop.xlane.xlu2 %875 }
 0x45a   : > { %v878_v61 = vsub.f32 %v868_v43, %v876_v59 }
 0x45c   : > { %v2722_v62 = vpop.eup %2355  ;;  %v881_v63 = vmul.f32 1.442695, %v878_v61 }
 0x45d   : > { %v883_v0 = vsel %vm580_vm5, %v2722_v62, 0.0 }
 0x45e   : > { %2357 = vpow2.f32 %v881_v63  ;;  %884 = vadd.xlane.f32.xlu2 %v883_v0 }
 0x461   : > { %v921_v2 = vpop.permute.xlu2 %920 }
 0x462   : > { %v926_v3 = vand.u32 %v921_v2, %v2680_v40 }
 0x464   : > { %v2728_v4 = vpop.eup %2357  ;;  %v826_v6 = vpop.permute.xlu0 %825  ;;  %935 = vmatpush.bf16.msrb.mxu1 %v926_v3 }
 0x465   : > { %v831_v7 = vand.u32 %v826_v6, %v2680_v40  ;;  %v886_v8 = vsel %vm584_vm6, %v2728_v4, 0.0 }
 0x466   : > { %887 = vadd.xlane.f32.xlu1 %v886_v8 }
 0x467   : > { %840 = vmatpush.bf16.msrb.mxu3 %v831_v7 }
 0x46a   : > { %1089 = vrot.lane.b32.xlu0 %v2734_v10, %s2498_s27 }
 0x476   : > { %1087 = vrot.lane.b32.xlu2 %v2740_v14, %s2497_s26 }
 0x47f   : > { %994 = vrot.lane.b32.xlu1 %v2734_v10, %s2496_s25  ;;  %s2256_s25 = sshll.u32 %s2486_s17, 4 }
 0x4c1   : > { %v790_v58 = vpop.xlane.xlu1 %789 }
 0x4c2   : > { %2359 = vrcp.f32 %v790_v58  ;;  %v805_v24 = vand.u32 2147483648, %v790_v58  ;;  %vm799_vm14 = vweird.f32 %v790_v58  ;;  %v803_v26 = vand.u32 2147483647, %v790_v58 }
 0x4c4   : > { %v806_v33 = vor.u32 1.1754944e-38, %v805_v24  ;;  %vm804_vm2 = vcmp.eq.f32.partialorder %v803_v26, 8.507059e+37 }
 0x4c8   : > { %v2360_v15 = vpop.eup %2359 }
 0x4c9   : > { %v795_v16 = vmul.f32 %v2360_v15, %v790_v58  ;;  %v793_v17 = vpop.xlane.xlu0 %792  ;;  %vm800_vm13 = vweird.f32 %v2360_v15 }
 0x4ca   : > { %2361 = vrcp.f32 %v793_v17  ;;  %vm2746_vm15 = vmor %vm799_vm14, %vm800_vm13  ;;  %v820_v30 = vand.u32 2147483648, %v793_v17  ;;  %v818_v32 = vand.u32 2147483647, %v793_v17  ;;  %vm814_vm1 = vweird.f32 %v793_v17 }
 0x4cb   : > { %v796_v18 = vsub.f32 1.0, %v795_v16 }
 0x4cc   : > { %v821_v39 = vor.u32 1.1754944e-38, %v820_v30  ;;  %vm819_vm8 = vcmp.eq.f32.partialorder %v818_v32, 8.507059e+37 }
 0x4cd   : > { %v797_v19 = vmul.f32 %v2360_v15, %v796_v18 }
 0x4cf   : > { %v798_v60 = vadd.f32 %v2360_v15, %v797_v19 }
 0x4d0   : > { %v2362_v21 = vpop.eup %2361 }
 0x4d1   : > { %v810_v22 = vmul.f32 %v2362_v21, %v793_v17  ;;  %v885_v23 = vpop.xlane.xlu2 %884  ;;  %vm815_vm0 = vweird.f32 %v2362_v21  ;;  %v802_v31 = vsel %vm2746_vm15, %v2360_v15, %v798_v60 }
 0x4d2   : > { %2363 = vrcp.f32 %v885_v23  ;;  %vm816_vm7 = vmor %vm814_vm1, %vm815_vm0  ;;  %v807_v43 = vsel %vm804_vm2, %v806_v33, %v802_v31  ;;  %v900_v49 = vand.u32 2147483648, %v885_v23  ;;  %vm894_vm10 = vweird.f32 %v885_v23 }
 0x4d3   : > { %v811_v25 = vsub.f32 1.0, %v810_v22  ;;  %v808_v47 = vmul.f32 %v2714_v51, %v807_v43  ;;  %v898_v59 = vand.u32 2147483647, %v885_v23 }
 0x4d4   : > { %v901_v1 = vor.u32 1.1754944e-38, %v900_v49 }
 0x4d5   : > { %v812_v29 = vmul.f32 %v2362_v21, %v811_v25  ;;  %vm899_vm13 = vcmp.eq.f32.partialorder %v898_v59, 8.507059e+37 }
 0x4d7   : > { %v813_v36 = vadd.f32 %v2362_v21, %v812_v29 }
 0x4d8   : > { %v2364_v37 = vpop.eup %2363 }
 0x4d9   : > { %v817_v38 = vsel %vm816_vm7, %v2362_v21, %v813_v36  ;;  %v890_v41 = vmul.f32 %v2364_v37, %v885_v23  ;;  %v888_v42 = vpop.xlane.xlu1 %887  ;;  %vm895_vm9 = vweird.f32 %v2364_v37  ;;  %v1088_v58 = vpop.permute.xlu2 %1087 }
 0x4da   : > { %2365 = vrcp.f32 %v888_v42  ;;  %v822_v45 = vsel %vm819_vm8, %v821_v39, %v817_v38  ;;  %vm896_vm11 = vmor %vm894_vm10, %vm895_vm9  ;;  %v915_v63 = vand.u32 2147483648, %v888_v42  ;;  %vm909_vm14 = vweird.f32 %v888_v42 }
 0x4db   : > { %v891_v44 = vsub.f32 1.0, %v890_v41  ;;  %v823_v48 = vmul.f32 %v2718_v56, %v822_v45  ;;  %v913_v56 = vand.u32 2147483647, %v888_v42 }
 0x4dc   : > { %v1090_v46 = vpop.permute.xlu0 %1089  ;;  %v916_v3 = vor.u32 1.1754944e-38, %v915_v63 }
 0x4dd   : > { %v892_v50 = vmul.f32 %v2364_v37, %v891_v44  ;;  %v1095_v52 = vsel %vm559_vm4, %v1090_v46, 0  ;;  %v824_v53 = vpack.c.bf16 %v823_v48, %v808_v47  ;;  %vm914_vm0 = vcmp.eq.f32.partialorder %v913_v56, 8.507059e+37 }
 0x4de   : > { %1104 = vmatpush.bf16.xpose.msra.mxu1 %v1095_v52 }
 0x4df   : > { %2174 = vmatmul.msk.bf16.vlgmr.msrb.gmra.mxu3 %vm580_vm5, %v824_v53  ;;  %v893_v55 = vadd.f32 %v2364_v37, %v892_v50 }
 0x4e0   : > { %v2366_v54 = vpop.eup %2365 }
 0x4e1   : > { %v905_v57 = vmul.f32 %v2366_v54, %v888_v42  ;;  %v897_v51 = vsel %vm896_vm11, %v2364_v37, %v893_v55  ;;  %vm910_vm12 = vweird.f32 %v2366_v54 }
 0x4e2   : > { %vm911_vm15 = vmor %vm909_vm14, %vm910_vm12  ;;  %v902_v5 = vsel %vm899_vm13, %v901_v1, %v897_v51 }
 0x4e3   : > { %v906_v61 = vsub.f32 1.0, %v905_v57  ;;  %v903_v8 = vmul.f32 %v2722_v62, %v902_v5 }
 0x4e5   : > { %v907_v0 = vmul.f32 %v2366_v54, %v906_v61 }
 0x4e7   : > { %v908_v2 = vadd.f32 %v2366_v54, %v907_v0 }
 0x4e9   : > { %v912_v6 = vsel %vm911_vm15, %v2366_v54, %v908_v2 }
 0x4ea   : > { %v917_v7 = vsel %vm914_vm0, %v916_v3, %v912_v6 }
 0x4eb   : > { %v918_v9 = vmul.f32 %v2728_v4, %v917_v7 }
 0x4ed   : > { %v919_v11 = vpack.c.bf16 %v918_v9, %v903_v8 }
 0x4ef   : > { %2176 = vmatmul.msk.bf16.vlgmr.msrb.gmra.mxu1 %vm580_vm5, %v919_v11 }
 0x4f1   : > { %v995_v12 = vpop.permute.xlu1 %994 }
 0x4f2   : > { %v1000_v13 = vsel %vm559_vm4, %v995_v12, 0 }
 0x4f3   : > { %1009 = vmatpush.bf16.xpose.msra.mxu3 %v1000_v13 }
 0x4fa   : > { %2177 = vmatmul.msk.bf16.vlgmr.msra.gmra.mxu3 %vm559_vm4, %v2740_v14 }
 0x4ff   : > { %2179 = vmatmul.msk.bf16.vlgmr.msra.gmra.mxu1 %vm559_vm4, %v1088_v58 }
 0x562   : > { %v2763_v15 = vpop.f32.mrf.mxu3 }
 0x56a   : > { %v2769_v4 = vpop.f32.mrf.mxu3 }
 0x56c   : > { %v2765_v16 = vpop.f32.mrf.mxu1 }
 0x574   : > { %v2767_v62 = vpop.f32.mrf.mxu1 }
 0x57c   : > { %v1106_v17 = vpop.f32.mrf.mxu1 }
 0x57d   : > { %v1011_v18 = vpop.f32.mrf.mxu3  ;;  %v1111_v19 = vsel %vm580_vm5, %v1106_v17, -inf }
 0x57e   : > { %1112 = vmax.xlane.f32.xlu2 %v1111_v19  ;;  %v1016_v21 = vsel %vm580_vm5, %v1011_v18, -inf }
 0x57f   : > { %1017 = vmax.xlane.f32.xlu0 %v1016_v21 }
 0x584   : > { %v1108_v22 = vpop.f32.mrf.mxu1 }
 0x585   : > { %v1013_v23 = vpop.f32.mrf.mxu3  ;;  %v1114_v60 = vsel %vm584_vm6, %v1108_v22, -inf }
 0x586   : > { %v1019_v24 = vsel %vm584_vm6, %v1013_v23, -inf }
 0x587   : > { %1115 = vmax.xlane.f32.xlu0 %v1114_v60  ;;  %1020 = vmax.xlane.f32.xlu1 %v1019_v24 }
 0x596   : > { %1065 = vrot.lane.b32.xlu2 %v2734_v10, %s2503_s13 }
 0x59b   : > { %1160 = vrot.lane.b32.xlu0 %v2734_v10, %s2499_s28  ;;  %s449_s28 = scalar_lea.vmem %s3123_s5, %s2256_s25 }
 0x5a0   : > { %1184 = vrot.lane.b32.xlu1 %v2734_v10, %s2501_s30 }
 0x5f1   : > { %v1113_v25 = vpop.xlane.xlu2 %1112 }
 0x5f2   : > { %v1117_v26 = vsub.f32 %v1106_v17, %v1113_v25  ;;  %v1018_v27 = vpop.xlane.xlu0 %1017 }
 0x5f3   : > { %v1022_v29 = vsub.f32 %v1011_v18, %v1018_v27 }
 0x5f4   : > { %v1119_v30 = vmul.f32 1.442695, %v1117_v26 }
 0x5f5   : > { %v1024_v31 = vmul.f32 1.442695, %v1022_v29 }
 0x5f6   : > { %2367 = vpow2.f32 %v1119_v30 }
 0x5f7   : > { %2369 = vpow2.f32 %v1024_v31 }
 0x5f9   : > { %v1066_v32 = vpop.permute.xlu2 %1065 }
 0x5fa   : > { %v1071_v33 = vand.u32 %v1066_v32, %v2680_v40  ;;  %v1116_v36 = vpop.xlane.xlu0 %1115  ;;  %v1021_v37 = vpop.xlane.xlu1 %1020 }
 0x5fb   : > { %v1118_v38 = vsub.f32 %v1108_v22, %v1116_v36  ;;  %v1023_v39 = vsub.f32 %v1013_v23, %v1021_v37 }
 0x5fc   : > { %v2782_v41 = vpop.eup %2367  ;;  %1080 = vmatpush.bf16.msra.mxu2 %v1071_v33 }
 0x5fd   : > { %v2784_v42 = vpop.eup %2369  ;;  %v1121_v43 = vmul.f32 1.442695, %v1118_v38  ;;  %v1026_v44 = vmul.f32 1.442695, %v1023_v39  ;;  %v1123_v45 = vsel %vm580_vm5, %v2782_v41, 0.0 }
 0x5fe   : > { %1124 = vadd.xlane.f32.xlu0 %v1123_v45  ;;  %v1028_v46 = vsel %vm580_vm5, %v2784_v42, 0.0 }
 0x5ff   : > { %2371 = vpow2.f32 %v1121_v43  ;;  %1029 = vadd.xlane.f32.xlu1 %v1028_v46 }
 0x600   : > { %2373 = vpow2.f32 %v1026_v44 }
 0x605   : > { %v2790_v47 = vpop.eup %2371 }
 0x606   : > { %v2792_v48 = vpop.eup %2373  ;;  %v1126_v50 = vsel %vm584_vm6, %v2790_v47, 0.0 }
 0x607   : > { %1127 = vadd.xlane.f32.xlu1 %v1126_v50  ;;  %v1031_v52 = vsel %vm584_vm6, %v2792_v48, 0.0 }
 0x608   : > { %1032 = vadd.xlane.f32.xlu2 %v1031_v52 }
 0x60d   : > { %v1161_v53 = vpop.permute.xlu0 %1160 }
 0x60e   : > { %v1166_v54 = vand.u32 %v1161_v53, %v2680_v40 }
 0x610   : > { %1175 = vmatpush.bf16.msrb.mxu3 %v1166_v54 }
 0x612   : > { %1279 = vrot.lane.b32.xlu0 %v2734_v10, %s2500_s29  ;;  %v1185_v55 = vpop.permute.xlu1 %1184  ;;  %s2141_s29 = sshll.u32 %s2486_s17, 3 }
 0x613   : > { %v1190_v57 = vsel %vm559_vm4, %v1185_v55, 0  ;;  %s455_s13 = scalar_lea.vmem %s3124_s6, %s2141_s29 }
 0x614   : > { %1199 = vmatpush.bf16.xpose.msrb.mxu2 %v1190_v57 }
 0x620   : > { %1182 = vrot.lane.b32.xlu2 %v2740_v14, %s2504_s14  ;;  %1277 = vrot.lane.b32.xlu1 %v2740_v14, %s2502_s12  ;;  %s2259_s14 = sshll.u32 %s2486_s17, 5 }
 0x621   : > { %s2990_s30 = scalar_lea.vmem %s3127_s9, %s2259_s14 }
 0x671   : > { %v1125_v49 = vpop.xlane.xlu0 %1124 }
 0x672   : > { %2375 = vrcp.f32 %v1125_v49  ;;  %v1030_v59 = vpop.xlane.xlu1 %1029  ;;  %v1138_v7 = vand.u32 2147483647, %v1125_v49  ;;  %v1140_v8 = vand.u32 2147483648, %v1125_v49  ;;  %vm1134_vm1 = vweird.f32 %v1125_v49 }
 0x673   : > { %2377 = vrcp.f32 %v1030_v59  ;;  %vm1039_vm7 = vweird.f32 %v1030_v59  ;;  %v1043_v58 = vand.u32 2147483647, %v1030_v59  ;;  %v1045_v21 = vand.u32 2147483648, %v1030_v59 }
 0x674   : > { %vm2806_vm9 = vcmp.eq.f32.partialorder %v1138_v7, 8.507059e+37  ;;  %v1141_v19 = vor.u32 1.1754944e-38, %v1140_v8 }
 0x675   : > { %vm1044_vm14 = vcmp.eq.f32.partialorder %v1043_v58, 8.507059e+37  ;;  %v1046_v38 = vor.u32 1.1754944e-38, %v1045_v21 }
 0x678   : > { %v2376_v61 = vpop.eup %2375 }
 0x679   : > { %v2378_v63 = vpop.eup %2377  ;;  %v1130_v51 = vmul.f32 %v2376_v61, %v1125_v49  ;;  %vm1135_vm2 = vweird.f32 %v2376_v61 }
 0x67a   : > { %v1035_v0 = vmul.f32 %v2378_v63, %v1030_v59  ;;  %v1128_v56 = vpop.xlane.xlu1 %1127  ;;  %vm1040_vm8 = vweird.f32 %v2378_v63  ;;  %vm2811_vm10 = vmor %vm1134_vm1, %vm1135_vm2 }
 0x67b   : > { %v1131_v1 = vsub.f32 1.0, %v1130_v51  ;;  %v1033_v2 = vpop.xlane.xlu2 %1032  ;;  %2379 = vrcp.f32 %v1128_v56  ;;  %v1153_v25 = vand.u32 2147483647, %v1128_v56  ;;  %v1155_v26 = vand.u32 2147483648, %v1128_v56  ;;  %vm2819_vm11 = vmor %vm1039_vm7, %vm1040_vm8 }
 0x67c   : > { %v1036_v3 = vsub.f32 1.0, %v1035_v0  ;;  %2381 = vrcp.f32 %v1033_v2  ;;  %v1060_v31 = vand.u32 2147483648, %v1033_v2  ;;  %v1058_v37 = vand.u32 2147483647, %v1033_v2 }
 0x67d   : > { %v1132_v5 = vmul.f32 %v2376_v61, %v1131_v1  ;;  %vm1149_vm15 = vweird.f32 %v1128_v56  ;;  %vm1054_vm0 = vweird.f32 %v1033_v2  ;;  %v1156_v45 = vor.u32 1.1754944e-38, %v1155_v26 }
 0x67e   : > { %v1037_v6 = vmul.f32 %v2378_v63, %v1036_v3  ;;  %v1061_v50 = vor.u32 1.1754944e-38, %v1060_v31  ;;  %vm1154_vm7 = vcmp.eq.f32.partialorder %v1153_v25, 8.507059e+37  ;;  %vm1059_vm8 = vcmp.eq.f32.partialorder %v1058_v37, 8.507059e+37 }
 0x67f   : > { %v1133_v11 = vadd.f32 %v2376_v61, %v1132_v5 }
 0x680   : > { %v1038_v13 = vadd.f32 %v2378_v63, %v1037_v6 }
 0x681   : > { %v2380_v9 = vpop.eup %2379  ;;  %v1137_v29 = vsel %vm2811_vm10, %v2376_v61, %v1133_v11 }
 0x682   : > { %v2382_v14 = vpop.eup %2381  ;;  %v1145_v12 = vmul.f32 %v2380_v9, %v1128_v56  ;;  %vm1150_vm12 = vweird.f32 %v2380_v9  ;;  %v1042_v33 = vsel %vm2819_vm11, %v2378_v63, %v1038_v13  ;;  %v1142_v43 = vsel %vm2806_vm9, %v1141_v19, %v1137_v29 }
 0x683   : > { %v1050_v17 = vmul.f32 %v2382_v14, %v1033_v2  ;;  %vm1055_vm13 = vweird.f32 %v2382_v14  ;;  %vm1151_vm1 = vmor %vm1149_vm15, %vm1150_vm12  ;;  %v1047_v46 = vsel %vm1044_vm14, %v1046_v38, %v1042_v33  ;;  %v1143_v55 = vmul.f32 %v2782_v41, %v1142_v43  ;;  %v1183_v56 = vpop.permute.xlu2 %1182 }
 0x684   : > { %v1146_v22 = vsub.f32 1.0, %v1145_v12  ;;  %v1280_v23 = vpop.permute.xlu0 %1279  ;;  %vm1056_vm2 = vmor %vm1054_vm0, %vm1055_vm13  ;;  %v1048_v59 = vmul.f32 %v2784_v42, %v1047_v46 }
 0x685   : > { %v1051_v24 = vsub.f32 1.0, %v1050_v17  ;;  %v1285_v27 = vsel %vm559_vm4, %v1280_v23, 0 }
 0x686   : > { %v1147_v32 = vmul.f32 %v2380_v9, %v1146_v22  ;;  %1294 = vmatpush.bf16.xpose.msra.mxu3 %v1285_v27 }
 0x687   : > { %v1052_v36 = vmul.f32 %v2382_v14, %v1051_v24 }
 0x688   : > { %v1148_v39 = vadd.f32 %v2380_v9, %v1147_v32 }
 0x689   : > { %v1053_v44 = vadd.f32 %v2382_v14, %v1052_v36 }
 0x68a   : > { %v1152_v52 = vsel %vm1151_vm1, %v2380_v9, %v1148_v39 }
 0x68b   : > { %v1057_v53 = vsel %vm1056_vm2, %v2382_v14, %v1053_v44  ;;  %v1157_v54 = vsel %vm1154_vm7, %v1156_v45, %v1152_v52 }
 0x68c   : > { %v1062_v57 = vsel %vm1059_vm8, %v1061_v50, %v1057_v53  ;;  %v1158_v49 = vmul.f32 %v2790_v47, %v1157_v54 }
 0x68d   : > { %v1063_v61 = vmul.f32 %v2792_v48, %v1062_v57 }
 0x68e   : > { %v1159_v63 = vpack.c.bf16 %v1158_v49, %v1143_v55 }
 0x68f   : > { %v1064_v51 = vpack.c.bf16 %v1063_v61, %v1048_v59 }
 0x690   : > { %2180 = vmatmul.msk.bf16.vlgmr.msrb.gmra.mxu3 %vm580_vm5, %v1159_v63 }
 0x691   : > { %2178 = vmatmul.msk.bf16.vlgmr.msra.gmra.mxu2 %vm580_vm5, %v1064_v51 }
 0x692   : > { %v1278_v0 = vpop.permute.xlu1 %1277 }
 0x6a0   : > { %2183 = vmatmul.msk.bf16.vlgmr.msra.gmra.mxu3 %vm559_vm4, %v1278_v0 }
 0x6a1   : > { %2181 = vmatmul.msk.bf16.vlgmr.msrb.gmra.mxu2 %vm559_vm4, %v1183_v56 }
 0x713   : > { %v1177_v41 = vpop.f32.mrf.mxu3 }
 0x714   : > { %v2835_v1 = vpop.f32.mrf.mxu2  ;;  %v2319_v33 = vpack.i.bf16 %v2704_v28, %v1177_v41 }
 0x71b   : > { %v1179_v47 = vpop.f32.mrf.mxu3 }
 0x71c   : > { %v2837_v2 = vpop.f32.mrf.mxu2 }
 0x723   : > { %v1296_v42 = vpop.f32.mrf.mxu3 }
 0x724   : > { %v1201_v48 = vpop.f32.mrf.mxu2  ;;  %v1301_v3 = vsel %vm580_vm5, %v1296_v42, -inf }
 0x725   : > { %v1206_v5 = vsel %vm580_vm5, %v1201_v48, -inf  ;;  %1302 = vmax.xlane.f32.xlu1 %v1301_v3 }
 0x726   : > { %1207 = vmax.xlane.f32.xlu0 %v1206_v5 }
 0x72b   : > { %v1298_v8 = vpop.f32.mrf.mxu3 }
 0x72c   : > { %v1203_v6 = vpop.f32.mrf.mxu2  ;;  %v1304_v9 = vsel %vm584_vm6, %v1298_v8, -inf }
 0x72d   : > { %v1209_v7 = vsel %vm584_vm6, %v1203_v6, -inf }
 0x72e   : > { %1210 = vmax.xlane.f32.xlu2 %v1209_v7 }
 0x736   : > { %1305 = vmax.xlane.f32.xlu2 %v1304_v9 }
 0x798   : > { %v1303_v14 = vpop.xlane.xlu1 %1302 }
 0x799   : > { %v1208_v11 = vpop.xlane.xlu0 %1207  ;;  %v1307_v12 = vsub.f32 %v1296_v42, %v1303_v14 }
 0x79a   : > { %v1212_v13 = vsub.f32 %v1201_v48, %v1208_v11 }
 0x79b   : > { %v1309_v58 = vmul.f32 1.442695, %v1307_v12 }
 0x79c   : > { %v1214_v17 = vmul.f32 1.442695, %v1212_v13 }
 0x79d   : > { %2383 = vpow2.f32 %v1309_v58 }
 0x79e   : > { %2385 = vpow2.f32 %v1214_v17 }
 0x7a1   : > { %v1211_v18 = vpop.xlane.xlu2 %1210 }
 0x7a2   : > { %v1213_v19 = vsub.f32 %v1203_v6, %v1211_v18 }
 0x7a3   : > { %v2843_v21 = vpop.eup %2383 }
 0x7a4   : > { %v2845_v22 = vpop.eup %2385  ;;  %v1216_v23 = vmul.f32 1.442695, %v1213_v19  ;;  %v1313_v60 = vsel %vm580_vm5, %v2843_v21, 0.0 }
 0x7a5   : > { %v1218_v24 = vsel %vm580_vm5, %v2845_v22, 0.0  ;;  %1314 = vadd.xlane.f32.xlu2 %v1313_v60 }
 0x7a6   : > { %2387 = vpow2.f32 %v1216_v23  ;;  %1219 = vadd.xlane.f32.xlu0 %v1218_v24 }
 0x7a9   : > { %v1306_v25 = vpop.xlane.xlu2 %1305 }
 0x7aa   : > { %v1308_v26 = vsub.f32 %v1298_v8, %v1306_v25 }
 0x7ac   : > { %v2851_v27 = vpop.eup %2387  ;;  %v1311_v29 = vmul.f32 1.442695, %v1308_v26 }
 0x7ad   : > { %v1221_v30 = vsel %vm584_vm6, %v2851_v27, 0.0 }
 0x7ae   : > { %2389 = vpow2.f32 %v1311_v29  ;;  %1222 = vadd.xlane.f32.xlu1 %v1221_v30 }
 0x7b4   : > { %v2855_v31 = vpop.eup %2389 }
 0x7b5   : > { %v1316_v32 = vsel %vm584_vm6, %v2855_v31, 0.0 }
 0x7b6   : > { %1317 = vadd.xlane.f32.xlu0 %v1316_v32 }
 0x7bd   : > { %1350 = vrot.lane.b32.xlu2 %v2734_v10, %s2507_s16 }
 0x7c7   : > { %1255 = vrot.lane.b32.xlu1 %v2734_v10, %s2506_s15 }
 0x7ca   : > { %2320 = vrot.lane.b32.xlu0 %v2319_v33, %s2508_s22 }
 0x7cf   : > { %944 = vrot.lane.b32.xlu1 %v2702_v20, %s2508_s22 }
 0x7d7   : > { %1376 = vrot.lane.b32.xlu1 %v1179_v47, %s2508_s22  ;;  %s1540_s22 = scalar_lea.vmem %s3126_s8, %s2259_s14  ;;  %s1919_s14 = scalar_lea.vmem %s3128_s10, %s2256_s25 }
 0x818   : > { %v1315_v36 = vpop.xlane.xlu2 %1314 }
 0x819   : > { %v1220_v37 = vpop.xlane.xlu0 %1219  ;;  %2391 = vrcp.f32 %v1315_v36  ;;  %vm1324_vm12 = vweird.f32 %v1315_v36  ;;  %v1328_v42 = vand.u32 2147483647, %v1315_v36  ;;  %v1330_v48 = vand.u32 2147483648, %v1315_v36 }
 0x81a   : > { %2393 = vrcp.f32 %v1220_v37  ;;  %v1235_v47 = vand.u32 2147483648, %v1220_v37  ;;  %vm1229_vm14 = vweird.f32 %v1220_v37  ;;  %v1233_v5 = vand.u32 2147483647, %v1220_v37 }
 0x81b   : > { %v1331_v19 = vor.u32 1.1754944e-38, %v1330_v48  ;;  %vm1329_vm8 = vcmp.eq.f32.partialorder %v1328_v42, 8.507059e+37 }
 0x81c   : > { %v1236_v18 = vor.u32 1.1754944e-38, %v1235_v47  ;;  %vm1234_vm7 = vcmp.eq.f32.partialorder %v1233_v5, 8.507059e+37 }
 0x81f   : > { %v2392_v39 = vpop.eup %2391 }
 0x820   : > { %v1351_v38 = vpop.permute.xlu2 %1350  ;;  %v2394_v45 = vpop.eup %2393  ;;  %v1320_v10 = vmul.f32 %v2392_v39, %v1315_v36  ;;  %vm1325_vm9 = vweird.f32 %v2392_v39 }
 0x821   : > { %v1223_v43 = vpop.xlane.xlu1 %1222  ;;  %v1356_v44 = vand.u32 %v1351_v38, %v2680_v40  ;;  %v1225_v46 = vmul.f32 %v2394_v45, %v1220_v37  ;;  %vm1230_vm10 = vweird.f32 %v2394_v45  ;;  %vm2870_vm15 = vmor %vm1324_vm12, %vm1325_vm9  ;;  %vm1404_vm12 = vcmask 1040384  }
 0x822   : > { %2395 = vrcp.f32 %v1223_v43  ;;  %v1321_v50 = vsub.f32 1.0, %v1320_v10  ;;  %v1248_v51 = vand.u32 2147483647, %v1223_v43  ;;  %v1250_v0 = vand.u32 2147483648, %v1223_v43  ;;  %vm2876_vm0 = vmor %vm1229_vm14, %vm1230_vm10 }
 0x823   : > { %1365 = vmatpush.bf16.msrb.mxu0 %v1356_v44  ;;  %v1226_v52 = vsub.f32 1.0, %v1225_v46  ;;  %vm1244_vm11 = vweird.f32 %v1223_v43 }
 0x824   : > { %v1322_v55 = vmul.f32 %v2392_v39, %v1321_v50  ;;  %vm1249_vm1 = vcmp.eq.f32.partialorder %v1248_v51, 8.507059e+37  ;;  %v1251_v11 = vor.u32 1.1754944e-38, %v1250_v0 }
 0x825   : > { %v1227_v57 = vmul.f32 %v2394_v45, %v1226_v52 }
 0x826   : > { %v1323_v63 = vadd.f32 %v2392_v39, %v1322_v55 }
 0x827   : > { %v1228_v56 = vadd.f32 %v2394_v45, %v1227_v57 }
 0x828   : > { %v2396_v28 = vpop.eup %2395  ;;  %v1327_v14 = vsel %vm2870_vm15, %v2392_v39, %v1323_v63 }
 0x829   : > { %v1240_v53 = vmul.f32 %v2396_v28, %v1223_v43  ;;  %v1318_v20 = vpop.xlane.xlu0 %1317  ;;  %vm1245_vm6 = vweird.f32 %v2396_v28  ;;  %v1232_v13 = vsel %vm2876_vm0, %v2394_v45, %v1228_v56  ;;  %v1332_v26 = vsel %vm1329_vm8, %v1331_v19, %v1327_v14 }
 0x82a   : > { %2397 = vrcp.f32 %v1318_v20  ;;  %vm2866_vm13 = vmor %vm1244_vm11, %vm1245_vm6  ;;  %v1345_v12 = vand.u32 2147483648, %v1318_v20  ;;  %v1343_v17 = vand.u32 2147483647, %v1318_v20  ;;  %vm1339_vm6 = vweird.f32 %v1318_v20 }
 0x82b   : > { %v1241_v54 = vsub.f32 1.0, %v1240_v53  ;;  %v1237_v24 = vsel %vm1234_vm7, %v1236_v18, %v1232_v13  ;;  %v1333_v38 = vmul.f32 %v2843_v21, %v1332_v26  ;;  %vm971_vm11 = vcmask 195584   ;;  %v2927_v13 = vld [vmem:[%s455_s13] sm:$0x3f] }
 0x82c   : > { %v1346_v25 = vor.u32 1.1754944e-38, %v1345_v12  ;;  %vm1344_vm10 = vcmp.eq.f32.partialorder %v1343_v17, 8.507059e+37  ;;  %v1238_v37 = vmul.f32 %v2845_v22, %v1237_v24  ;;  %v2437_v18 = vld [vmem:[#allocation2] sm:$0xff] }
 0x82d   : > { %v1242_v49 = vmul.f32 %v2396_v28, %v1241_v54 }
 0x82f   : > { %v1243_v59 = vadd.f32 %v2396_v28, %v1242_v49 }
 0x830   : > { %v2398_v61 = vpop.eup %2397 }
 0x831   : > { %v1335_v41 = vmul.f32 %v2398_v61, %v1318_v20  ;;  %v1247_v7 = vsel %vm2866_vm13, %v2396_v28, %v1243_v59  ;;  %vm1340_vm2 = vweird.f32 %v2398_v61 }
 0x832   : > { %v1252_v23 = vsel %vm1249_vm1, %v1251_v11, %v1247_v7  ;;  %vm1341_vm9 = vmor %vm1339_vm6, %vm1340_vm2 }
 0x833   : > { %v1336_v8 = vsub.f32 1.0, %v1335_v41  ;;  %v1253_v29 = vmul.f32 %v2851_v27, %v1252_v23 }
 0x835   : > { %v1337_v58 = vmul.f32 %v2398_v61, %v1336_v8  ;;  %v1254_v43 = vpack.c.bf16 %v1253_v29, %v1238_v37 }
 0x837   : > { %v1338_v60 = vadd.f32 %v2398_v61, %v1337_v58 }
 0x839   : > { %v1342_v30 = vsel %vm1341_vm9, %v2398_v61, %v1338_v60  ;;  %v1256_v32 = vpop.permute.xlu1 %1255 }
 0x83a   : > { %v1261_v33 = vand.u32 %v1256_v32, %v2680_v40  ;;  %v1347_v36 = vsel %vm1344_vm10, %v1346_v25, %v1342_v30  ;;  %v2438_v25 = vld [vmem:[#allocation2 + $0x8] sm:$0xff]  ;;  %vm1761_vm10 = vcmask 523264  }
 0x83b   : > { %v1348_v39 = vmul.f32 %v2855_v31, %v1347_v36  ;;  %v2257_v31 = vld [vmem:[%s449_s28] sm:$0xff] }
 0x83c   : > { %1270 = vmatpush.bf16.msrb.mxu1 %v1261_v33  ;;  %v1431_v46 = vsel %vm495_vm3, %v2257_v31, 0  ;;  %v2439_v33 = vld [vmem:[#allocation2 + $0x10] sm:$0x3] }
 0x83d   : > { %v1349_v44 = vpack.c.bf16 %v1348_v39, %v1333_v38  ;;  %v2511_v39 = vmov 32.0  }
 0x83e   : > { %2399 = vrcp.f32 %v2511_v39 }
 0x83f   : > { %2182 = vmatmul.msk.bf16.vlgmr.msrb.gmra.mxu1 %vm580_vm5, %v1254_v43  ;;  %2184 = vmatmul.msk.bf16.vlgmr.msrb.gmra.mxu0 %vm580_vm5, %v1349_v44  ;;  %vm968_vm5 = vcmask 130048  }
 0x841   : > { %v945_v57 = vpop.permute.xlu1 %944 }
 0x842   : > { %v966_v41 = vsel %vm559_vm4, %v2698_v34, %v945_v57  ;;  %v2263_v57 = vld [vmem:[%s1540_s22 + $0x18] sm:$0xff] }
 0x844   : > { %v2400_v43 = vpop.eup %2399 }
 0x845   : > { %v1468_v44 = vmul.f32 32.0, %v2400_v43  ;;  %vm1472_vm13 = vweird.f32 %v2400_v43 }
 0x849   : > { %v1377_v5 = vpop.permute.xlu1 %1376 }
 0x84a   : > { %v1397_v6 = vsel %vm559_vm4, %v2837_v2, %v1377_v5  ;;  %v1413_v2 = vperm.slane %v2927_v13, 0 }
 0x8bc   : > { %v1272_v27 = vpop.f32.mrf.mxu1  ;;  %v1367_v45 = vpop.f32.mrf.mxu0 }
 0x8bd   : > { %v2324_v40 = vpack.i.bf16 %v2769_v4, %v1272_v27  ;;  %v2329_v10 = vpack.i.bf16 %v2767_v62, %v1367_v45  ;;  %v2258_v4 = vld [vmem:[%s449_s28 + $0x8] sm:$0xff]  ;;  %v1469_v27 = vsub.f32 1.0, %v1468_v44 }
 0x8be   : > { %v1434_v62 = vsel %vm495_vm3, %v2258_v4, 0 }
 0x8bf   : > { %2325 = vrot.lane.b32.xlu0 %v2324_v40, %s2509_s23  ;;  %2330 = vrot.lane.b32.xlu2 %v2329_v10, %s2510_s24  ;;  %v1470_v45 = vmul.f32 %v2400_v43, %v1469_v27 }
 0x8c0   : > { %1442 = vmatpush.bf16.xpose.msra.mxu2 %v1434_v62 }
 0x8c1   : > { %v1471_v40 = vadd.f32 %v2400_v43, %v1470_v45 }
 0x8c3   : > { %v2933_v10 = vsel %vm1472_vm13, %v2400_v43, %v1471_v40 }
 0x8c4   : > { %v1274_v21 = vpop.f32.mrf.mxu1  ;;  %v1369_v22 = vpop.f32.mrf.mxu0 }
 0x8c7   : > { %952 = vrot.lane.b32.xlu0 %v2763_v15, %s2509_s23  ;;  %960 = vrot.lane.b32.xlu2 %v2765_v16, %s2510_s24  ;;  %v2321_v15 = vpop.permute.xlu0 %2320 }
 0x8c8   : > { %1443 = vmatpush.bf16.xpose.msra.mxu2 %v1431_v46  ;;  %v2322_v28 = vunpack.i.l.bf16 %v2321_v15  ;;  %v2323_v52 = vunpack.i.h.bf16 %v2321_v15 }
 0x8ca   : > { %v1396_v20 = vsel %vm559_vm4, %v2835_v1, %v2322_v28  ;;  %v967_v61 = vsel %vm559_vm4, %v2700_v35, %v2323_v52  ;;  %vm1463_vm4 = vcmask 254976  }
 0x8cf   : > { %1384 = vrot.lane.b32.xlu0 %v1274_v21, %s2509_s23  ;;  %1392 = vrot.lane.b32.xlu2 %v1369_v22, %s2510_s24  ;;  %s2142_s23 = sshll.u32 %s2486_s17, 1 }
 0x8d0   : > { %s458_s27 = scalar_lea.vmem %s3125_s7, %s2142_s23 }
 0x919   : > { %v2331_v16 = vpop.permute.xlu2 %2330 }
 0x91a   : > { %v2332_v54 = vunpack.i.l.bf16 %v2331_v16  ;;  %v2333_v0 = vunpack.i.h.bf16 %v2331_v16 }
 0x921   : > { %v961_v56 = vpop.permute.xlu2 %960 }
 0x929   : > { %v1393_v8 = vpop.permute.xlu2 %1392 }
 0x931   : > { %v2326_v50 = vpop.permute.xlu0 %2325 }
 0x932   : > { %v2327_v53 = vunpack.i.l.bf16 %v2326_v50  ;;  %v2328_v55 = vunpack.i.h.bf16 %v2326_v50 }
 0x934   : > { %v1398_v49 = vsel %vm968_vm5, %v1396_v20, %v2327_v53  ;;  %v970_v63 = vsel %vm968_vm5, %v967_v61, %v2328_v55 }
 0x935   : > { %v1400_v59 = vsel %vm971_vm11, %v1398_v49, %v2332_v54  ;;  %v973_v42 = vsel %vm971_vm11, %v970_v63, %v2333_v0  ;;  %v1588_v49 = vsel %vm495_vm3, %v2263_v57, 0  ;;  %v2261_v63 = vld [vmem:[%s1540_s22 + $0x8] sm:$0xff]  ;;  %v2260_v0 = vld [vmem:[%s1540_s22] sm:$0xff] }
 0x936   : > { %v1405_v51 = vrot.slane %v1400_v59, 7  ;;  %1594 = vmatpush.bf16.xpose.msra.mxu1 %v1588_v49  ;;  %v2262_v59 = vld [vmem:[%s1540_s22 + $0x10] sm:$0xff] }
 0x937   : > { %v1585_v61 = vsel %vm495_vm3, %v2262_v59, 0  ;;  %v2267_v49 = vld [vmem:[%s2990_s30 + $0x10] sm:$0xff] }
 0x938   : > { %v1410_v3 = vsel %vm1404_vm12, %v973_v42, %v1405_v51 }
 0x939   : > { %v953_v1 = vpop.permute.xlu0 %952 }
 0x93a   : > { %v969_v47 = vsel %vm968_vm5, %v966_v41, %v953_v1  ;;  %v1579_v41 = vsel %vm495_vm3, %v2260_v0, 0 }
 0x93b   : > { %v972_v48 = vsel %vm971_vm11, %v969_v47, %v961_v56 }
 0x93c   : > { %v1411_v35 = vpack.c.bf16 %v1410_v3, %v972_v48 }
 0x93e   : > { %2193 = vmatmul.msk.bf16.vlgmr.msra.gmra.mxu2 %vm495_vm3, %v1411_v35  ;;  %1595 = vmatpush.bf16.xpose.msra.mxu1 %v1585_v61  ;;  %v1775_v61 = vsel %vm1761_vm10, %v2267_v49, 0 }
 0x941   : > { %v1385_v7 = vpop.permute.xlu0 %1384 }
 0x942   : > { %v1399_v34 = vsel %vm968_vm5, %v1397_v6, %v1385_v7 }
 0x943   : > { %v1401_v9 = vsel %vm971_vm11, %v1399_v34, %v1393_v8 }
 0x944   : > { %v1406_v14 = vrot.slane %v1401_v9, 7 }
 0x946   : > { %v1407_v11 = vsel %vm1404_vm12, %v1405_v51, %v1406_v14  ;;  %v1582_v51 = vsel %vm495_vm3, %v2261_v63, 0 }
 0x947   : > { %v1412_v12 = vpack.c.bf16 %v1407_v11, %v1407_v11  ;;  %1596 = vmatpush.bf16.xpose.msra.mxu1 %v1582_v51 }
 0x94e   : > { %2194 = vmatmul.msk.bf16.gmra.mxu2 %vm495_vm3, %v1412_v12 }
 0x94f   : > { %1597 = vmatpush.bf16.xpose.msra.mxu1 %v1579_v41 }
 0x9c1   : > { %v1445_v58 = vpop.f32.mrf.mxu2 }
 0x9c2   : > { %v1446_v17 = vadd.f32 %v1445_v58, %v1413_v2 }
 0x9c4   : > { %v1454_v19 = vadd.f32 %v2437_v18, %v1446_v17 }
 0x9c6   : > { %v1457_v23 = vsel %vm495_vm3, %v1454_v19, 0.0 }
 0x9c7   : > { %1458 = vadd.xlane.f32.xlu1 %v1457_v23 }
 0x9c9   : > { %v1447_v60 = vpop.f32.mrf.mxu2 }
 0x9ca   : > { %v1448_v24 = vadd.f32 %v1447_v60, %v1413_v2  ;;  %v1531_v60 = vperm.slane %v2927_v13, 1 }
 0x9cc   : > { %v1455_v26 = vadd.f32 %v2438_v25, %v1448_v24 }
 0x9ce   : > { %v1460_v29 = vsel %vm495_vm3, %v1455_v26, 0.0 }
 0x9cf   : > { %1461 = vadd.xlane.f32.xlu0 %v1460_v29 }
 0x9d1   : > { %v1450_v30 = vpop.f32.mrf.mxu2 }
 0x9d2   : > { %v1451_v32 = vadd.f32 %v1450_v30, %v1413_v2 }
 0x9d4   : > { %v1456_v36 = vadd.f32 %v2439_v33, %v1451_v32  ;;  %v1535_v32 = vperm.slane %v2927_v13, 2 }
 0x9d6   : > { %v1464_v37 = vsel %vm1463_vm4, %v1456_v36, 0.0 }
 0x9d7   : > { %1465 = vadd.xlane.f32.xlu2 %v1464_v37 }
 0x9d9   : > { %v1452_v38 = vpop.f32.mrf.mxu2 }
 0xa3a   : > { %v1459_v21 = vpop.xlane.xlu1 %1458 }
 0xa3b   : > { %v1474_v22 = vmul.f32 %v2933_v10, %v1459_v21 }
 0xa3d   : > { %v1477_v4 = vsub.f32 %v1454_v19, %v1474_v22 }
 0xa3f   : > { %v1480_v62 = vmul.f32 %v1477_v4, %v1477_v4 }
 0xa41   : > { %v1483_v31 = vsel %vm495_vm3, %v1480_v62, 0.0 }
 0xa42   : > { %v1462_v46 = vpop.xlane.xlu0 %1461  ;;  %1484 = vadd.xlane.f32.xlu1 %v1483_v31  ;;  %v2982_v31 = vld [vmem:[%s458_s27] sm:$0x3] }
 0xa43   : > { %v1475_v15 = vmul.f32 %v2933_v10, %v1462_v46  ;;  %v1551_v46 = vperm.slane %v2982_v31, 0 }
 0xa45   : > { %v2938_v16 = vsub.f32 %v1455_v26, %v1475_v15 }
 0xa47   : > { %v1481_v28 = vmul.f32 %v2938_v16, %v2938_v16 }
 0xa49   : > { %v1486_v50 = vsel %vm495_vm3, %v1481_v28, 0.0 }
 0xa4a   : > { %1487 = vadd.xlane.f32.xlu0 %v1486_v50  ;;  %v1466_v52 = vpop.xlane.xlu2 %1465  ;;  %v2268_v50 = vld [vmem:[%s2990_s30 + $0x18] sm:$0xff] }
 0xa4b   : > { %v1476_v53 = vmul.f32 %v2933_v10, %v1466_v52 }
 0xa4d   : > { %v2944_v20 = vsub.f32 %v1456_v36, %v1476_v53  ;;  %v1778_v53 = vsel %vm1761_vm10, %v2268_v50, 0 }
 0xa4e   : > { %1784 = vmatpush.bf16.xpose.msrb.mxu3 %v1778_v53 }
 0xa4f   : > { %v1482_v54 = vmul.f32 %v2944_v20, %v2944_v20 }
 0xa51   : > { %v1489_v55 = vsel %vm1463_vm4, %v1482_v54, 0.0 }
 0xa52   : > { %1490 = vadd.xlane.f32.xlu2 %v1489_v55 }
 0xa56   : > { %1785 = vmatpush.bf16.xpose.msrb.mxu3 %v1775_v61 }
 0xab5   : > { %v1485_v56 = vpop.xlane.xlu1 %1484 }
 0xab6   : > { %v1492_v1 = vmul.f32 %v1485_v56, %v2933_v10 }
 0xab8   : > { %v1495_v47 = vadd.f32 1e-05, %v1492_v1 }
 0xaba   : > { %2401 = vrsqrt.f32 %v1495_v47  ;;  %vm1504_vm15 = vweird.f32 %v1495_v47 }
 0xabd   : > { %v1488_v42 = vpop.xlane.xlu0 %1487 }
 0xabe   : > { %v1493_v48 = vmul.f32 %v1488_v42, %v2933_v10 }
 0xac0   : > { %v2402_v3 = vpop.eup %2401  ;;  %v1496_v35 = vadd.f32 1e-05, %v1493_v48  ;;  %v2266_v48 = vld [vmem:[%s2990_s30 + $0x8] sm:$0xff] }
 0xac1   : > { %v1499_v5 = vmul.f32 %v2402_v3, %v1495_v47  ;;  %vm1505_vm14 = vweird.f32 %v2402_v3 }
 0xac2   : > { %2403 = vrsqrt.f32 %v1496_v35  ;;  %vm1506_vm0 = vmor %vm1504_vm15, %vm1505_vm14  ;;  %vm1514_vm2 = vweird.f32 %v1496_v35 }
 0xac3   : > { %v1500_v6 = vmul.f32 %v2402_v3, %v1499_v5 }
 0xac5   : > { %v1501_v7 = vmul.f32 0.5, %v1500_v6  ;;  %v1491_v8 = vpop.xlane.xlu2 %1490 }
 0xac6   : > { %v1494_v34 = vmul.f32 %v1491_v8, %v2933_v10  ;;  %v1772_v8 = vsel %vm1761_vm10, %v2266_v48, 0 }
 0xac7   : > { %v1502_v9 = vsub.f32 1.5, %v1501_v7  ;;  %1786 = vmatpush.bf16.xpose.msrb.mxu3 %v1772_v8 }
 0xac8   : > { %v2404_v14 = vpop.eup %2403  ;;  %v1497_v11 = vadd.f32 1e-05, %v1494_v34 }
 0xac9   : > { %v1503_v12 = vmul.f32 %v2402_v3, %v1502_v9  ;;  %v1509_v2 = vmul.f32 %v2404_v14, %v1496_v35  ;;  %vm1515_vm1 = vweird.f32 %v2404_v14 }
 0xaca   : > { %2405 = vrsqrt.f32 %v1497_v11  ;;  %vm1516_vm7 = vmor %vm1514_vm2, %vm1515_vm1  ;;  %vm1524_vm6 = vweird.f32 %v1497_v11 }
 0xacb   : > { %v1510_v58 = vmul.f32 %v2404_v14, %v1509_v2  ;;  %v1507_v17 = vsel %vm1506_vm0, %v2402_v3, %v1503_v12 }
 0xacc   : > { %v1528_v24 = vmul.f32 %v1507_v17, %v1477_v4 }
 0xacd   : > { %v1511_v18 = vmul.f32 0.5, %v1510_v58 }
 0xace   : > { %v1532_v33 = vmul.f32 %v1531_v60, %v1528_v24 }
 0xacf   : > { %v1512_v19 = vsub.f32 1.5, %v1511_v18 }
 0xad0   : > { %v2406_v23 = vpop.eup %2405  ;;  %v2965_v43 = vadd.f32 %v1535_v32, %v1532_v33 }
 0xad1   : > { %v1513_v25 = vmul.f32 %v2404_v14, %v1512_v19  ;;  %v1519_v26 = vmul.f32 %v2406_v23, %v1497_v11  ;;  %vm1525_vm8 = vweird.f32 %v2406_v23 }
 0xad2   : > { %vm1526_vm9 = vmor %vm1524_vm6, %vm1525_vm8 }
 0xad3   : > { %v1517_v29 = vsel %vm1516_vm7, %v2404_v14, %v1513_v25  ;;  %v1520_v30 = vmul.f32 %v2406_v23, %v1519_v26 }
 0xad4   : > { %v1529_v36 = vmul.f32 %v1517_v29, %v2938_v16 }
 0xad5   : > { %v1521_v37 = vmul.f32 0.5, %v1520_v30 }
 0xad6   : > { %v1533_v38 = vmul.f32 %v1531_v60, %v1529_v36 }
 0xad7   : > { %v1522_v39 = vsub.f32 1.5, %v1521_v37 }
 0xad8   : > { %v2967_v44 = vadd.f32 %v1535_v32, %v1533_v38 }
 0xad9   : > { %v1523_v27 = vmul.f32 %v2406_v23, %v1522_v39 }
 0xada   : > { %v1549_v45 = vpack.c.bf16 %v2967_v44, %v2965_v43 }
 0xadb   : > { %v1527_v40 = vsel %vm1526_vm9, %v2406_v23, %v1523_v27  ;;  %v2265_v23 = vld [vmem:[%s2990_s30] sm:$0xff] }
 0xadc   : > { %2212 = vmatmul.msk.bf16.vlgmr.msra.gmra.mxu1 %vm495_vm3, %v1549_v45  ;;  %v1530_v21 = vmul.f32 %v1527_v40, %v2944_v20  ;;  %v1769_v25 = vsel %vm1761_vm10, %v2265_v23, 0 }
 0xadd   : > { %1787 = vmatpush.bf16.xpose.msrb.mxu3 %v1769_v25 }
 0xade   : > { %v1534_v22 = vmul.f32 %v1531_v60, %v1530_v21 }
 0xae0   : > { %v2973_v4 = vadd.f32 %v1535_v32, %v1534_v22 }
 0xae2   : > { %v1550_v62 = vpack.c.bf16 %v2973_v4, %v2973_v4 }
 0xaec   : > { %2213 = vmatmul.msk.bf16.gmra.mxu1 %vm495_vm3, %v1550_v62 }
 0xb59   : > { %v1599_v15 = vpop.f32.mrf.mxu1 }
 0xb5a   : > { %v2992_v16 = vadd.f32 %v1599_v15, %v1551_v46 }
 0xb5c   : > { %v2995_v28 = vmul.f32 0.70710677, %v2992_v16 }
 0xb5e   : > { %v1614_v52 = vand.u32 2147483647, %v2995_v28 }
 0xb60   : > { %v1617_v20 = vmul.f32 0.3275911, %v1614_v52  ;;  %v1695_v18 = vsub.f32 0.0, %v1614_v52 }
 0xb61   : > { %v1601_v54 = vpop.f32.mrf.mxu1 }
 0xb62   : > { %v1620_v55 = vadd.f32 1.0, %v1617_v20  ;;  %v3000_v57 = vadd.f32 %v1601_v54, %v1551_v46  ;;  %v1698_v30 = vmul.f32 %v1695_v18, %v1614_v52 }
 0xb64   : > { %2407 = vrcp.f32 %v1620_v55  ;;  %v3004_v59 = vmul.f32 0.70710677, %v3000_v57  ;;  %v1634_v35 = vand.u32 2147483648, %v1620_v55  ;;  %v1632_v7 = vand.u32 2147483647, %v1620_v55 }
 0xb65   : > { %vm1628_vm11 = vweird.f32 %v1620_v55  ;;  %v1701_v40 = vmul.f32 1.442695, %v1698_v30 }
 0xb66   : > { %v3008_v63 = vand.u32 2147483647, %v3004_v59  ;;  %v1635_v11 = vor.u32 1.1754944e-38, %v1634_v35  ;;  %vm1633_vm14 = vcmp.eq.f32.partialorder %v1632_v7, 8.507059e+37 }
 0xb68   : > { %v1618_v51 = vmul.f32 0.3275911, %v3008_v63 }
 0xb69   : > { %v1604_v0 = vpop.f32.mrf.mxu1 }
 0xb6a   : > { %v2408_v56 = vpop.eup %2407  ;;  %v3011_v41 = vadd.f32 %v1604_v0, %v1551_v46  ;;  %v1621_v47 = vadd.f32 1.0, %v1618_v51  ;;  %v1696_v46 = vsub.f32 0.0, %v3008_v63 }
 0xb6b   : > { %v1624_v1 = vmul.f32 %v2408_v56, %v1620_v55  ;;  %vm1629_vm5 = vweird.f32 %v2408_v56 }
 0xb6c   : > { %v3014_v42 = vmul.f32 0.70710677, %v3011_v41  ;;  %2409 = vrcp.f32 %v1621_v47  ;;  %vm1630_vm13 = vmor %vm1628_vm11, %vm1629_vm5  ;;  %v1649_v29 = vand.u32 2147483648, %v1621_v47  ;;  %v1647_v33 = vand.u32 2147483647, %v1621_v47 }
 0xb6d   : > { %v1625_v3 = vsub.f32 1.0, %v1624_v1  ;;  %vm1643_vm0 = vweird.f32 %v1621_v47  ;;  %v1699_v61 = vmul.f32 %v1696_v46, %v3008_v63  ;;  %vm1713_vm5 = vcmp.ge.f32.partialorder %v2995_v28, 0.0 }
 0xb6e   : > { %v3018_v5 = vand.u32 2147483647, %v3014_v42  ;;  %v1650_v27 = vor.u32 1.1754944e-38, %v1649_v29  ;;  %vm1648_vm2 = vcmp.eq.f32.partialorder %v1647_v33, 8.507059e+37  ;;  %vm1714_vm11 = vcmp.ge.f32.partialorder %v3004_v59, 0.0 }
 0xb6f   : > { %v1626_v6 = vmul.f32 %v2408_v56, %v1625_v3  ;;  %v1703_v7 = vmul.f32 1.442695, %v1699_v61 }
 0xb70   : > { %v1619_v34 = vmul.f32 0.3275911, %v3018_v5  ;;  %v1697_v3 = vsub.f32 0.0, %v3018_v5 }
 0xb71   : > { %v1627_v9 = vadd.f32 %v2408_v56, %v1626_v6  ;;  %v1606_v14 = vpop.f32.mrf.mxu1 }
 0xb72   : > { %v1622_v12 = vadd.f32 1.0, %v1619_v34  ;;  %v2410_v2 = vpop.eup %2409 }
 0xb73   : > { %v1631_v58 = vsel %vm1630_vm13, %v2408_v56, %v1627_v9  ;;  %v1639_v19 = vmul.f32 %v2410_v2, %v1621_v47  ;;  %vm1644_vm15 = vweird.f32 %v2410_v2  ;;  %vm1715_vm13 = vcmp.ge.f32.partialorder %v3014_v42, 0.0 }
 0xb74   : > { %v1636_v17 = vsel %vm1633_vm14, %v1635_v11, %v1631_v58  ;;  %2411 = vrcp.f32 %v1622_v12  ;;  %vm1645_vm1 = vmor %vm1643_vm0, %vm1644_vm15  ;;  %v1664_v52 = vand.u32 2147483648, %v1622_v12  ;;  %v1662_v54 = vand.u32 2147483647, %v1622_v12 }
 0xb75   : > { %v1668_v60 = vmul.f32 1.0614054, %v1636_v17  ;;  %v1640_v24 = vsub.f32 1.0, %v1639_v19  ;;  %2413 = vpow2.f32 %v1701_v40  ;;  %vm1658_vm8 = vweird.f32 %v1622_v12 }
 0xb76   : > { %v1665_v56 = vor.u32 1.1754944e-38, %v1664_v52  ;;  %vm1663_vm9 = vcmp.eq.f32.partialorder %v1662_v54, 8.507059e+37  ;;  %2415 = vpow2.f32 %v1703_v7  ;;  %v1608_v40 = vmul.f32 0.5, %v2992_v16 }
 0xb77   : > { %v1671_v26 = vadd.f32 -1.4531521, %v1668_v60  ;;  %v1641_v32 = vmul.f32 %v2410_v2, %v1640_v24  ;;  %v1740_v16 = vperm.slane %v2982_v31, 1 }
 0xb79   : > { %v1674_v36 = vmul.f32 %v1671_v26, %v1636_v17  ;;  %v1642_v38 = vadd.f32 %v2410_v2, %v1641_v32 }
 0xb7a   : > { %v2412_v37 = vpop.eup %2411 }
 0xb7b   : > { %v1677_v39 = vadd.f32 1.4214138, %v1674_v36  ;;  %v1654_v45 = vmul.f32 %v2412_v37, %v1622_v12  ;;  %v1646_v21 = vsel %vm1645_vm1, %v2410_v2, %v1642_v38  ;;  %vm1659_vm7 = vweird.f32 %v2412_v37  ;;  %v2414_v34 = vpop.eup %2413 }
 0xb7c   : > { %v1651_v62 = vsel %vm1648_vm2, %v1650_v27, %v1646_v21  ;;  %vm1660_vm6 = vmor %vm1658_vm8, %vm1659_vm7  ;;  %v1700_v12 = vmul.f32 %v1697_v3, %v3018_v5  ;;  %v1609_v21 = vmul.f32 0.5, %v3000_v57 }
 0xb7d   : > { %v1680_v22 = vmul.f32 %v1677_v39, %v1636_v17  ;;  %v1655_v15 = vsub.f32 1.0, %v1654_v45  ;;  %v1669_v50 = vmul.f32 1.0614054, %v1651_v62 }
 0xb7e   : > { %v1705_v60 = vmul.f32 1.442695, %v1700_v12 }
 0xb7f   : > { %v1683_v53 = vadd.f32 -0.28449672, %v1680_v22  ;;  %v1656_v20 = vmul.f32 %v2412_v37, %v1655_v15  ;;  %v1672_v55 = vadd.f32 -1.4531521, %v1669_v50 }
 0xb80   : > { %2417 = vpow2.f32 %v1705_v60 }
 0xb81   : > { %v1686_v49 = vmul.f32 %v1683_v53, %v1636_v17  ;;  %v1657_v51 = vadd.f32 %v2412_v37, %v1656_v20  ;;  %v1675_v0 = vmul.f32 %v1672_v55, %v1651_v62  ;;  %v1610_v20 = vmul.f32 0.5, %v3011_v41 }
 0xb83   : > { %v1689_v1 = vadd.f32 0.2548296, %v1686_v49  ;;  %v1661_v47 = vsel %vm1660_vm6, %v2412_v37, %v1657_v51  ;;  %v1678_v48 = vadd.f32 1.4214138, %v1675_v0 }
 0xb84   : > { %v1666_v35 = vsel %vm1663_vm9, %v1665_v56, %v1661_v47 }
 0xb85   : > { %v1692_v6 = vmul.f32 %v1689_v1, %v1636_v17  ;;  %v1670_v8 = vmul.f32 1.0614054, %v1666_v35  ;;  %v1681_v9 = vmul.f32 %v1678_v48, %v1651_v62  ;;  %v2416_v17 = vpop.eup %2415 }
 0xb86   : > { %v2418_v27 = vpop.eup %2417 }
 0xb87   : > { %v1707_v14 = vmul.f32 %v2414_v34, %v1692_v6  ;;  %v1673_v11 = vadd.f32 -1.4531521, %v1670_v8  ;;  %v1684_v63 = vadd.f32 -0.28449672, %v1681_v9  ;;  %v2271_v34 = vld [vmem:[%s1919_s14 + $0x8] sm:$0xff] }
 0xb89   : > { %v1676_v2 = vmul.f32 %v1673_v11, %v1666_v35  ;;  %v1710_v58 = vsub.f32 1.0, %v1707_v14  ;;  %v1687_v18 = vmul.f32 %v1684_v63, %v1651_v62 }
 0xb8b   : > { %v1679_v19 = vadd.f32 1.4214138, %v1676_v2  ;;  %v1690_v23 = vadd.f32 0.2548296, %v1687_v18  ;;  %v1716_v25 = vsub.f32 0.0, %v1710_v58  ;;  %v1947_v2 = vsel %vm1761_vm10, %v2271_v34, 0 }
 0xb8c   : > { %1955 = vmatpush.bf16.xpose.msra.mxu0 %v1947_v2 }
 0xb8d   : > { %v1682_v24 = vmul.f32 %v1679_v19, %v1666_v35  ;;  %v1693_v26 = vmul.f32 %v1690_v23, %v1651_v62  ;;  %v1719_v33 = vsel %vm1713_vm5, %v1710_v58, %v1716_v25 }
 0xb8e   : > { %v1722_v38 = vadd.f32 1.0, %v1719_v33 }
 0xb8f   : > { %v1685_v29 = vadd.f32 -0.28449672, %v1682_v24  ;;  %v1708_v30 = vmul.f32 %v2416_v17, %v1693_v26 }
 0xb90   : > { %v1725_v46 = vmul.f32 %v1722_v38, %v1608_v40 }
 0xb91   : > { %v1688_v32 = vmul.f32 %v1685_v29, %v1666_v35  ;;  %v1711_v36 = vsub.f32 1.0, %v1708_v30  ;;  %v2270_v30 = vld [vmem:[%s1919_s14] sm:$0xff] }
 0xb93   : > { %v1691_v5 = vadd.f32 0.2548296, %v1688_v32  ;;  %v1717_v37 = vsub.f32 0.0, %v1711_v36 }
 0xb95   : > { %v1694_v39 = vmul.f32 %v1691_v5, %v1666_v35  ;;  %v1720_v45 = vsel %vm1714_vm11, %v1711_v36, %v1717_v37  ;;  %v1944_v36 = vsel %vm1761_vm10, %v2270_v30, 0 }
 0xb96   : > { %v1723_v22 = vadd.f32 1.0, %v1720_v45  ;;  %1956 = vmatpush.bf16.xpose.msra.mxu0 %v1944_v36 }
 0xb97   : > { %v1709_v62 = vmul.f32 %v2418_v27, %v1694_v39 }
 0xb98   : > { %v1726_v15 = vmul.f32 %v1723_v22, %v1609_v21 }
 0xb99   : > { %v1712_v28 = vsub.f32 1.0, %v1709_v62 }
 0xb9a   : > { %v1738_v50 = vpack.c.bf16 %v1726_v15, %v1725_v46 }
 0xb9b   : > { %v1718_v52 = vsub.f32 0.0, %v1712_v28 }
 0xb9c   : > { %2231 = vmatmul.msk.bf16.vlgmr.msrb.gmra.mxu3 %vm1761_vm10, %v1738_v50 }
 0xb9d   : > { %v1721_v53 = vsel %vm1715_vm13, %v1712_v28, %v1718_v52 }
 0xb9e   : > { %v1724_v59 = vadd.f32 1.0, %v1721_v53 }
 0xba0   : > { %v1727_v54 = vmul.f32 %v1724_v59, %v1610_v20 }
 0xba2   : > { %v1739_v55 = vpack.c.bf16 %v1727_v54, %v1727_v54 }
 0xbac   : > { %2232 = vmatmul.msk.bf16.gmra.mxu3 %vm1761_vm10, %v1739_v55 }
 0xc1f   : > { %v1789_v57 = vpop.f32.mrf.mxu3 }
 0xc20   : > { %v3037_v49 = vadd.f32 %v1789_v57, %v1740_v16 }
 0xc22   : > { %v3040_v61 = vmul.f32 0.70710677, %v3037_v49 }
 0xc24   : > { %v1804_v51 = vand.u32 2147483647, %v3040_v61 }
 0xc26   : > { %v1807_v42 = vmul.f32 0.3275911, %v1804_v51  ;;  %v1885_v17 = vsub.f32 0.0, %v1804_v51 }
 0xc27   : > { %v1791_v0 = vpop.f32.mrf.mxu3 }
 0xc28   : > { %v1810_v56 = vadd.f32 1.0, %v1807_v42  ;;  %v3043_v1 = vadd.f32 %v1791_v0, %v1740_v16  ;;  %v1888_v38 = vmul.f32 %v1885_v17, %v1804_v51 }
 0xc2a   : > { %2419 = vrcp.f32 %v1810_v56  ;;  %v3046_v41 = vmul.f32 0.70710677, %v3043_v1  ;;  %v1824_v14 = vand.u32 2147483648, %v1810_v56  ;;  %v1822_v12 = vand.u32 2147483647, %v1810_v56 }
 0xc2b   : > { %vm1818_vm15 = vweird.f32 %v1810_v56  ;;  %v1891_v15 = vmul.f32 1.442695, %v1888_v38 }
 0xc2c   : > { %v3049_v47 = vand.u32 2147483647, %v3046_v41  ;;  %v1825_v23 = vor.u32 1.1754944e-38, %v1824_v14  ;;  %vm1823_vm1 = vcmp.eq.f32.partialorder %v1822_v12, 8.507059e+37 }
 0xc2e   : > { %v1808_v31 = vmul.f32 0.3275911, %v3049_v47  ;;  %v1886_v53 = vsub.f32 0.0, %v3049_v47 }
 0xc2f   : > { %v1794_v48 = vpop.f32.mrf.mxu3 }
 0xc30   : > { %v2420_v3 = vpop.eup %2419  ;;  %v3057_v35 = vadd.f32 %v1794_v48, %v1740_v16  ;;  %v1811_v7 = vadd.f32 1.0, %v1808_v31  ;;  %v1889_v0 = vmul.f32 %v1886_v53, %v3049_v47 }
 0xc31   : > { %v1814_v6 = vmul.f32 %v2420_v3, %v1810_v56  ;;  %vm1819_vm14 = vweird.f32 %v2420_v3 }
 0xc32   : > { %v3060_v8 = vmul.f32 0.70710677, %v3057_v35  ;;  %2421 = vrcp.f32 %v1811_v7  ;;  %vm1820_vm0 = vmor %vm1818_vm15, %vm1819_vm14  ;;  %v1839_v37 = vand.u32 2147483648, %v1811_v7  ;;  %v1837_v27 = vand.u32 2147483647, %v1811_v7 }
 0xc33   : > { %v1815_v9 = vsub.f32 1.0, %v1814_v6  ;;  %vm1833_vm7 = vweird.f32 %v1811_v7  ;;  %vm1903_vm14 = vcmp.ge.f32.partialorder %v3040_v61, 0.0  ;;  %vm1904_vm15 = vcmp.ge.f32.partialorder %v3046_v41, 0.0 }
 0xc34   : > { %v3063_v11 = vand.u32 2147483647, %v3060_v8  ;;  %v1840_v62 = vor.u32 1.1754944e-38, %v1839_v37  ;;  %vm1838_vm6 = vcmp.eq.f32.partialorder %v1837_v27, 8.507059e+37 }
 0xc35   : > { %v1816_v63 = vmul.f32 %v2420_v3, %v1815_v9 }
 0xc36   : > { %v1809_v58 = vmul.f32 0.3275911, %v3063_v11  ;;  %v1887_v34 = vsub.f32 0.0, %v3063_v11 }
 0xc37   : > { %v1817_v18 = vadd.f32 %v2420_v3, %v1816_v63  ;;  %v1796_v19 = vpop.f32.mrf.mxu3  ;;  %v1893_v63 = vmul.f32 1.442695, %v1889_v0 }
 0xc38   : > { %v1812_v60 = vadd.f32 1.0, %v1809_v58  ;;  %v2422_v24 = vpop.eup %2421 }
 0xc39   : > { %v1821_v25 = vsel %vm1820_vm0, %v2420_v3, %v1817_v18  ;;  %v1829_v29 = vmul.f32 %v2422_v24, %v1811_v7  ;;  %vm1834_vm2 = vweird.f32 %v2422_v24  ;;  %vm1905_vm0 = vcmp.ge.f32.partialorder %v3060_v8, 0.0 }
 0xc3a   : > { %v1826_v26 = vsel %vm1823_vm1, %v1825_v23, %v1821_v25  ;;  %2423 = vrcp.f32 %v1812_v60  ;;  %vm1835_vm8 = vmor %vm1833_vm7, %vm1834_vm2  ;;  %v1854_v54 = vand.u32 2147483648, %v1812_v60  ;;  %v1852_v57 = vand.u32 2147483647, %v1812_v60 }
 0xc3b   : > { %v1858_v32 = vmul.f32 1.0614054, %v1826_v26  ;;  %v1830_v33 = vsub.f32 1.0, %v1829_v29  ;;  %2425 = vpow2.f32 %v1891_v15  ;;  %vm1848_vm5 = vweird.f32 %v1812_v60 }
 0xc3c   : > { %v1855_v48 = vor.u32 1.1754944e-38, %v1854_v54  ;;  %vm1853_vm13 = vcmp.eq.f32.partialorder %v1852_v57, 8.507059e+37  ;;  %v1890_v23 = vmul.f32 %v1887_v34, %v3063_v11  ;;  %2427 = vpow2.f32 %v1893_v63 }
 0xc3d   : > { %v1861_v5 = vadd.f32 -1.4531521, %v1858_v32  ;;  %v1831_v39 = vmul.f32 %v2422_v24, %v1830_v33  ;;  %v1799_v15 = vmul.f32 0.5, %v3043_v1 }
 0xc3e   : > { %v1895_v30 = vmul.f32 1.442695, %v1890_v23 }
 0xc3f   : > { %v1864_v45 = vmul.f32 %v1861_v5, %v1826_v26  ;;  %v1832_v21 = vadd.f32 %v2422_v24, %v1831_v39 }
 0xc40   : > { %v2424_v40 = vpop.eup %2423  ;;  %2429 = vpow2.f32 %v1895_v30 }
 0xc41   : > { %v1867_v22 = vadd.f32 1.4214138, %v1864_v45  ;;  %v1844_v46 = vmul.f32 %v2424_v40, %v1812_v60  ;;  %v1836_v28 = vsel %vm1835_vm8, %v2422_v24, %v1832_v21  ;;  %vm1849_vm9 = vweird.f32 %v2424_v40  ;;  %v2426_v2 = vpop.eup %2425 }
 0xc42   : > { %v1841_v52 = vsel %vm1838_vm6, %v1840_v62, %v1836_v28  ;;  %vm1850_vm11 = vmor %vm1848_vm5, %vm1849_vm9 }
 0xc43   : > { %v1870_v50 = vmul.f32 %v1867_v22, %v1826_v26  ;;  %v1845_v59 = vsub.f32 1.0, %v1844_v46  ;;  %v1859_v20 = vmul.f32 1.0614054, %v1841_v52  ;;  %v1798_v46 = vmul.f32 0.5, %v3037_v49 }
 0xc44   : > { %v1926_v49 = vperm.slane %v2927_v13, 5 }
 0xc45   : > { %v1873_v55 = vadd.f32 -0.28449672, %v1870_v50  ;;  %v1846_v16 = vmul.f32 %v2424_v40, %v1845_v59  ;;  %v1862_v51 = vadd.f32 -1.4531521, %v1859_v20 }
 0xc47   : > { %v1876_v42 = vmul.f32 %v1873_v55, %v1826_v26  ;;  %v1847_v56 = vadd.f32 %v2424_v40, %v1846_v16  ;;  %v1865_v31 = vmul.f32 %v1862_v51, %v1841_v52  ;;  %v1800_v55 = vmul.f32 0.5, %v3057_v35 }
 0xc49   : > { %v1879_v3 = vadd.f32 0.2548296, %v1876_v42  ;;  %v1851_v6 = vsel %vm1850_vm11, %v2424_v40, %v1847_v56  ;;  %v1868_v7 = vadd.f32 1.4214138, %v1865_v31 }
 0xc4a   : > { %v1856_v9 = vsel %vm1853_vm13, %v1855_v48, %v1851_v6 }
 0xc4b   : > { %v1882_v14 = vmul.f32 %v1879_v3, %v1826_v26  ;;  %v1860_v12 = vmul.f32 1.0614054, %v1856_v9  ;;  %v1871_v58 = vmul.f32 %v1868_v7, %v1841_v52  ;;  %v2428_v26 = vpop.eup %2427 }
 0xc4c   : > { %v2430_v22 = vpop.eup %2429 }
 0xc4d   : > { %v1897_v18 = vmul.f32 %v2426_v2, %v1882_v14  ;;  %v1863_v19 = vadd.f32 -1.4531521, %v1860_v12  ;;  %v1874_v47 = vadd.f32 -0.28449672, %v1871_v58 }
 0xc4f   : > { %v1866_v60 = vmul.f32 %v1863_v19, %v1856_v9  ;;  %v1900_v24 = vsub.f32 1.0, %v1897_v18  ;;  %v1877_v25 = vmul.f32 %v1874_v47, %v1841_v52 }
 0xc51   : > { %v1869_v17 = vadd.f32 1.4214138, %v1866_v60  ;;  %v1880_v29 = vadd.f32 0.2548296, %v1877_v25  ;;  %v1906_v33 = vsub.f32 0.0, %v1900_v24 }
 0xc53   : > { %v1872_v32 = vmul.f32 %v1869_v17, %v1856_v9  ;;  %v1883_v36 = vmul.f32 %v1880_v29, %v1841_v52  ;;  %v1909_v39 = vsel %vm1903_vm14, %v1900_v24, %v1906_v33 }
 0xc54   : > { %v1912_v40 = vadd.f32 1.0, %v1909_v39 }
 0xc55   : > { %v1875_v5 = vadd.f32 -0.28449672, %v1872_v32  ;;  %v1898_v37 = vmul.f32 %v2428_v26, %v1883_v36 }
 0xc56   : > { %v1915_v52 = vmul.f32 %v1912_v40, %v1798_v46 }
 0xc57   : > { %v1878_v38 = vmul.f32 %v1875_v5, %v1856_v9  ;;  %v1901_v27 = vsub.f32 1.0, %v1898_v37 }
 0xc59   : > { %v1881_v11 = vadd.f32 0.2548296, %v1878_v38  ;;  %v1907_v45 = vsub.f32 0.0, %v1901_v27 }
 0xc5b   : > { %v1884_v21 = vmul.f32 %v1881_v11, %v1856_v9  ;;  %v1910_v62 = vsel %vm1904_vm15, %v1901_v27, %v1907_v45 }
 0xc5c   : > { %v1913_v28 = vadd.f32 1.0, %v1910_v62 }
 0xc5d   : > { %v1899_v50 = vmul.f32 %v2430_v22, %v1884_v21  ;;  %v2036_v22 = vperm.slane %v2927_v13, 3 }
 0xc5e   : > { %v1916_v53 = vmul.f32 %v1913_v28, %v1799_v15  ;;  %v2040_v15 = vperm.slane %v2927_v13, 4 }
 0xc5f   : > { %v1902_v61 = vsub.f32 1.0, %v1899_v50 }
 0xc60   : > { %v1924_v59 = vpack.c.bf16 %v1916_v53, %v1915_v52 }
 0xc61   : > { %v1908_v20 = vsub.f32 0.0, %v1902_v61 }
 0xc62   : > { %2242 = vmatmul.msk.bf16.vlgmr.msra.gmra.mxu0 %vm1761_vm10, %v1924_v59 }
 0xc63   : > { %v1911_v54 = vsel %vm1905_vm0, %v1902_v61, %v1908_v20 }
 0xc64   : > { %v1914_v41 = vadd.f32 1.0, %v1911_v54 }
 0xc66   : > { %v1917_v16 = vmul.f32 %v1914_v41, %v1800_v55 }
 0xc68   : > { %v1925_v57 = vpack.c.bf16 %v1917_v16, %v1917_v16 }
 0xc72   : > { %2243 = vmatmul.msk.bf16.gmra.mxu0 %vm1761_vm10, %v1925_v57 }
 0xcdf   : > { %v1958_v1 = vpop.f32.mrf.mxu0 }
 0xce0   : > { %v1959_v51 = vadd.f32 %v1958_v1, %v1926_v49 }
 0xce2   : > { %v1967_v42 = vadd.f32 %v1959_v51, %v2965_v43 }
 0xce4   : > { %v1970_v0 = vsel %vm495_vm3, %v1967_v42, 0.0 }
 0xce5   : > { %1971 = vadd.xlane.f32.xlu1 %v1970_v0 }
 0xce7   : > { %v1960_v56 = vpop.f32.mrf.mxu0 }
 0xce8   : > { %v1961_v31 = vadd.f32 %v1960_v56, %v1926_v49 }
 0xcea   : > { %v1968_v8 = vadd.f32 %v1961_v31, %v2967_v44 }
 0xcec   : > { %v1973_v48 = vsel %vm495_vm3, %v1968_v8, 0.0 }
 0xced   : > { %1974 = vadd.xlane.f32.xlu0 %v1973_v48 }
 0xcef   : > { %v1963_v35 = vpop.f32.mrf.mxu0 }
 0xcf0   : > { %v1964_v3 = vadd.f32 %v1963_v35, %v1926_v49 }
 0xcf2   : > { %v1969_v6 = vadd.f32 %v1964_v3, %v2973_v4 }
 0xcf4   : > { %v1976_v7 = vsel %vm1463_vm4, %v1969_v6, 0.0 }
 0xcf5   : > { %1977 = vadd.xlane.f32.xlu2 %v1976_v7 }
 0xcf7   : > { %v1965_v34 = vpop.f32.mrf.mxu0 }
 0xd58   : > { %v1972_v9 = vpop.xlane.xlu1 %1971 }
 0xd59   : > { %v1979_v43 = vmul.f32 %v1972_v9, %v2933_v10 }
 0xd5b   : > { %v1982_v14 = vsub.f32 %v1967_v42, %v1979_v43 }
 0xd5d   : > { %v1985_v63 = vmul.f32 %v1982_v14, %v1982_v14 }
 0xd5f   : > { %v1988_v12 = vsel %vm495_vm3, %v1985_v63, 0.0 }
 0xd60   : > { %v1975_v2 = vpop.xlane.xlu0 %1974  ;;  %1989 = vadd.xlane.f32.xlu1 %v1988_v12 }
 0xd61   : > { %v1980_v44 = vmul.f32 %v1975_v2, %v2933_v10 }
 0xd63   : > { %v1983_v58 = vsub.f32 %v1968_v8, %v1980_v44 }
 0xd65   : > { %v1986_v18 = vmul.f32 %v1983_v58, %v1983_v58 }
 0xd67   : > { %v1991_v19 = vsel %vm495_vm3, %v1986_v18, 0.0 }
 0xd68   : > { %v1978_v4 = vpop.xlane.xlu2 %1977  ;;  %1992 = vadd.xlane.f32.xlu0 %v1991_v19 }
 0xd69   : > { %v1981_v47 = vmul.f32 %v1978_v4, %v2933_v10 }
 0xd6b   : > { %v1984_v23 = vsub.f32 %v1969_v6, %v1981_v47 }
 0xd6d   : > { %v1987_v60 = vmul.f32 %v1984_v23, %v1984_v23 }
 0xd6f   : > { %v1994_v24 = vsel %vm1463_vm4, %v1987_v60, 0.0 }
 0xd70   : > { %1995 = vadd.xlane.f32.xlu2 %v1994_v24 }
 0xdd3   : > { %v1990_v25 = vpop.xlane.xlu1 %1989 }
 0xdd4   : > { %v1997_v17 = vmul.f32 %v1990_v25, %v2933_v10 }
 0xdd6   : > { %v2000_v29 = vadd.f32 1e-05, %v1997_v17 }
 0xdd8   : > { %2431 = vrsqrt.f32 %v2000_v29  ;;  %vm2009_vm1 = vweird.f32 %v2000_v29 }
 0xddb   : > { %v1993_v30 = vpop.xlane.xlu0 %1992 }
 0xddc   : > { %v1998_v32 = vmul.f32 %v1993_v30, %v2933_v10 }
 0xdde   : > { %v2432_v33 = vpop.eup %2431  ;;  %v2001_v36 = vadd.f32 1e-05, %v1998_v32 }
 0xddf   : > { %v2004_v26 = vmul.f32 %v2432_v33, %v2000_v29  ;;  %vm2010_vm10 = vweird.f32 %v2432_v33 }
 0xde0   : > { %2433 = vrsqrt.f32 %v2001_v36  ;;  %vm2011_vm2 = vmor %vm2009_vm1, %vm2010_vm10  ;;  %vm2019_vm8 = vweird.f32 %v2001_v36 }
 0xde1   : > { %v2005_v5 = vmul.f32 %v2432_v33, %v2004_v26 }
 0xde3   : > { %v2006_v37 = vmul.f32 0.5, %v2005_v5  ;;  %v1996_v38 = vpop.xlane.xlu2 %1995 }
 0xde4   : > { %v1999_v39 = vmul.f32 %v1996_v38, %v2933_v10 }
 0xde5   : > { %v2007_v27 = vsub.f32 1.5, %v2006_v37 }
 0xde6   : > { %v2434_v11 = vpop.eup %2433  ;;  %v2002_v45 = vadd.f32 1e-05, %v1999_v39 }
 0xde7   : > { %v2008_v40 = vmul.f32 %v2432_v33, %v2007_v27  ;;  %v2014_v21 = vmul.f32 %v2434_v11, %v2001_v36  ;;  %vm2020_vm7 = vweird.f32 %v2434_v11 }
 0xde8   : > { %2435 = vrsqrt.f32 %v2002_v45  ;;  %vm2021_vm6 = vmor %vm2019_vm8, %vm2020_vm7  ;;  %vm2029_vm5 = vweird.f32 %v2002_v45 }
 0xde9   : > { %v2012_v62 = vsel %vm2011_vm2, %v2432_v33, %v2008_v40  ;;  %v2015_v46 = vmul.f32 %v2434_v11, %v2014_v21 }
 0xdea   : > { %v2033_v28 = vmul.f32 %v2012_v62, %v1982_v14 }
 0xdeb   : > { %v2016_v50 = vmul.f32 0.5, %v2015_v46 }
 0xdec   : > { %v2037_v52 = vmul.f32 %v2036_v22, %v2033_v28 }
 0xded   : > { %v2017_v53 = vsub.f32 1.5, %v2016_v50 }
 0xdee   : > { %v2436_v10 = vpop.eup %2435  ;;  %v2041_v61 = vadd.f32 %v2040_v15, %v2037_v52 }
 0xdef   : > { %v2018_v59 = vmul.f32 %v2434_v11, %v2017_v53  ;;  %v2024_v20 = vmul.f32 %v2436_v10, %v2002_v45  ;;  %vm2030_vm9 = vweird.f32 %v2436_v10 }
 0xdf0   : > { %2044 = vst.msk [vmem:[#allocation2] sm:$0xff] %vm495_vm3, %v2041_v61  ;;  %vm2031_vm11 = vmor %vm2029_vm5, %vm2030_vm9 }
 0xdf1   : > { %v2022_v54 = vsel %vm2021_vm6, %v2434_v11, %v2018_v59  ;;  %v2025_v41 = vmul.f32 %v2436_v10, %v2024_v20 }
 0xdf2   : > { %v2034_v55 = vmul.f32 %v2022_v54, %v1983_v58 }
 0xdf3   : > { %v2026_v16 = vmul.f32 0.5, %v2025_v41 }
 0xdf4   : > { %v2038_v57 = vmul.f32 %v2036_v22, %v2034_v55 }
 0xdf5   : > { %v2027_v49 = vsub.f32 1.5, %v2026_v16 }
 0xdf6   : > { %v2042_v13 = vadd.f32 %v2040_v15, %v2038_v57 }
 0xdf7   : > { %v2028_v1 = vmul.f32 %v2436_v10, %v2027_v49 }
 0xdf8   : > { %2045 = vst.msk [vmem:[#allocation2 + $0x8] sm:$0xff] %vm495_vm3, %v2042_v13 }
 0xdf9   : > { %v2032_v51 = vsel %vm2031_vm11, %v2436_v10, %v2028_v1 }
 0xdfa   : > { %v2035_v42 = vmul.f32 %v2032_v51, %v1984_v23 }
 0xdfc   : > { %v2039_v0 = vmul.f32 %v2036_v22, %v2035_v42  ;;  %2050 = sbr.rel (%p2244_p5) target bundleno = 3587 (0xe03), region = 72 }
 0xdfe   : > { %v2043_v56 = vadd.f32 %v2040_v15, %v2039_v0 }
 0xe00   : > { %2046 = vst.msk [vmem:[#allocation2 + $0x10] sm:$0x3] %vm1463_vm4, %v2043_v56 }
 0xe01   : > { %v2051_v31 = vsel %vm1404_vm12, %v2041_v61, %v2042_v13 }
 0xe02   : > { %2052 = vst.msk [vmem:[#allocation3] sm:$0x3] %vm1463_vm4, %v2051_v31 }
 0xe03 PF: > { %p2276_p6 = scmp.eq.s32.totalorder %s2132_s20, 2  ;;  %s2063_s16 = sshll.u32 %s3129_s11, 4  ;;  %s2064_s16 = int_to_ptr.hbm [resolvable:$true] %s2063_s16 }
 0xe04   : > { %s2512_s22 = smov [#allocation3]  }
 0xe05   : > { %s2061_s23 = sshll.u32 %s2512_s22, 4  ;;  %s2062_s23 = int_to_ptr.vmem [resolvable:$true] %s2061_s23 }
 0xe06   : > { %2273 = dma.vmem_to_hbm [thread:$0]  (%p2276_p6), %s2062_s23, 32, %s2064_s16, [#allocation4]  }
 0xe07   : > { %2481 = dma.done.wait (%p2276_p6), [#allocation4], 32  }
 0xe08   : > { %2483 = vsyncadd (%p2276_p6), [#allocation4], 4294967264 }
 0xe09 PF: > { %s22_s19 = sadd.s32 1, %s2494_s19   ;;  %s3144_s17 = smov %s2490_s18 }
 0xe0a   : > { %p19_p7 = scmp.ge.s32.totalorder %s22_s19, 5   ;;  %s3145_s18 = smov %s3147_s21 }
 0xe0c   :  { %21 = sbr.rel (!%p19_p7) target bundleno = 2 (0x2), region = 109 }
 0xe11   :  { %2077 = vsyncpa [#allocation4], 1 }
 0xe12   :  { %2079 = vsyncpa [#allocation4 + $0x1], 1 }

</bundles_post_ra>
